<compile_context>
chip_gen: v7x
topology: tpu7x:2x2x1
jax: 0.10.0
libtpu: 0.0.40
codegen_flags: <defaults>
</compile_context>

<pallas_src>
import math

import jax
import jax.numpy as jnp
from jax.experimental import pallas as pl
from jax.experimental.pallas import tpu as pltpu


NUM_HEADS = 2   # AttentionModule(input_dim, 2)
GP = 128        # gate pitch: one GRU gate (r/z/n) per 128-lane block
CP = 128        # lane-padded classifier width


def _sigmoid(x):
    return 1.0 / (1.0 + jnp.exp(-x))


def _row_layout(E, H, heads):
    """Row offsets of each parameter block inside the packed (rows, 3*GP) slab.
    Every block starts on an 8-sublane boundary (E, H are multiples of 8 here)."""
    r_qkv = 0                        # heads blocks of E rows: per-head QKV weights
    r_bqkv = r_qkv + heads * E       # heads blocks of 8 rows: head-h bias at +8*h
    r_wf = r_bqkv + 8 * heads        # E rows: wout @ wih (gate-padded)
    r_bf = r_wf + E                  # 8 rows, row 0 = bout @ wih + bih
    r_whh = r_bf + 8                 # H rows: recurrent weight (gate-padded)
    r_bhh = r_whh + H                # 8 rows, row 0
    r_wfc = r_bhh + 8                # H rows: fc weight (classes in lanes 0:C)
    r_bfc = r_wfc + H                # 8 rows, row 0
    rows = r_bfc + 8
    return dict(qkv=r_qkv, bqkv=r_bqkv, wf=r_wf, bf=r_bf, whh=r_whh,
                bhh=r_bhh, wfc=r_wfc, bfc=r_bfc, rows=rows)


def init_params(key, input_dim, rnn_hidden_size, num_classes):
    """Natural-layout params, weights pre-transposed to (in_features, out_features)."""
    E, H, C = input_dim, rnn_hidden_size, num_classes
    ks = jax.random.split(key, 10)
    u = lambda k, shape, s: jax.random.uniform(k, shape, jnp.float32, -s, s)
    s_attn = 1.0 / math.sqrt(E)
    s_rnn = 1.0 / math.sqrt(H)
    return {
        # MultiheadAttention: in_proj_weight.T -> (E, 3E) [Q|K|V], out_proj.weight.T
        "wqkv": u(ks[0], (E, 3 * E), s_attn), "bqkv": u(ks[1], (1, 3 * E), s_attn),
        "wout": u(ks[2], (E, E), s_attn), "bout": u(ks[3], (1, E), s_attn),
        # GRU layer 0, gate order [r, z, n]; weight_ih.T -> (E, 3H), weight_hh.T -> (H, 3H)
        "wih": u(ks[4], (E, 3 * H), s_rnn), "bih": u(ks[5], (1, 3 * H), s_rnn),
        "whh": u(ks[6], (H, 3 * H), s_rnn), "bhh": u(ks[7], (1, 3 * H), s_rnn),
        # classifier
        "wfc": u(ks[8], (H, C), s_rnn), "bfc": u(ks[9], (1, C), s_rnn),
    }


def pack_params(p, heads=NUM_HEADS):
    """Pack natural-layout params into one lane/sublane-aligned f32 VMEM slab."""
    E = p["wout"].shape[0]
    H = p["whh"].shape[0]
    C = p["wfc"].shape[1]
    Dh = E // heads
    G3 = 3 * GP
    lay = _row_layout(E, H, heads)
    hp = jax.lax.Precision.HIGHEST

    def pad_gates(w):  # (..., 3H) -> (..., 3*GP): gate g moved to lanes [g*GP, g*GP+H)
        out = jnp.zeros(w.shape[:-1] + (G3,), jnp.float32)
        for g in range(3):
            out = out.at[..., g * GP:g * GP + H].set(w[..., g * H:(g + 1) * H])
        return out

    wih_p = pad_gates(p["wih"])
    bih_p = pad_gates(p["bih"])

    slab = jnp.zeros((lay["rows"], G3), jnp.float32)

    # Per-head QKV weights / biases, each of Q/K/V on its own 128-lane block.
    for h in range(heads):
        blk = jnp.zeros((E, G3), jnp.float32)
        blk = blk.at[:, 0:Dh].set(p["wqkv"][:, h * Dh:(h + 1) * Dh])                    # Q_h
        blk = blk.at[:, GP:GP + Dh].set(p["wqkv"][:, E + h * Dh:E + (h + 1) * Dh])      # K_h
        blk = blk.at[:, 2 * GP:2 * GP + Dh].set(
            p["wqkv"][:, 2 * E + h * Dh:2 * E + (h + 1) * Dh])                          # V_h
        slab = slab.at[lay["qkv"] + h * E:lay["qkv"] + (h + 1) * E, :].set(blk)

        brow = jnp.zeros((G3,), jnp.float32)
        brow = brow.at[0:Dh].set(p["bqkv"][0, h * Dh:(h + 1) * Dh])
        brow = brow.at[GP:GP + Dh].set(p["bqkv"][0, E + h * Dh:E + (h + 1) * Dh])
        brow = brow.at[2 * GP:2 * GP + Dh].set(
            p["bqkv"][0, 2 * E + h * Dh:2 * E + (h + 1) * Dh])
        slab = slab.at[lay["bqkv"] + 8 * h, :].set(brow)

    # Fold the attention out-projection into the GRU input projection (HIGHEST prec).
    w_fused = jnp.dot(p["wout"], wih_p, precision=hp)              # (E, 3*GP)
    b_fused = jnp.dot(p["bout"], wih_p, precision=hp) + bih_p      # (1, 3*GP)
    slab = slab.at[lay["wf"]:lay["wf"] + E, :].set(w_fused)
    slab = slab.at[lay["bf"], :].set(b_fused[0])

    slab = slab.at[lay["whh"]:lay["whh"] + H, :].set(pad_gates(p["whh"]))
    slab = slab.at[lay["bhh"], :].set(pad_gates(p["bhh"])[0])

    slab = slab.at[lay["wfc"]:lay["wfc"] + H, 0:C].set(p["wfc"])
    slab = slab.at[lay["bfc"], 0:C].set(p["bfc"][0])
    return slab


def _make_kernel(B, T, E, H, heads, lay):
    Dh = E // heads
    G3 = 3 * GP
    scale = 1.0 / math.sqrt(Dh)

    def kernel(x_ref, slab_ref, out_ref):
        f32 = jnp.float32
        x2d = x_ref[...].reshape(B * T, E)                                  # (BT, E)

        # GRU input gate pre-activations with the attention out-proj folded in:
        #   gates = b_fused + sum_h ctx_h @ (wout_h @ wih)
        b_fused = slab_ref[pl.ds(lay["bf"], 1), :]                          # (1, 3GP)
        gates = jnp.broadcast_to(b_fused, (B * T, G3))

        for h in range(heads):                                              # unrolled (2)
            w_qkv = slab_ref[pl.ds(lay["qkv"] + h * E, E), :]               # (E, 3GP)
            b_qkv = slab_ref[pl.ds(lay["bqkv"] + 8 * h, 1), :]              # (1, 3GP)
            qkv = jnp.dot(x2d, w_qkv, preferred_element_type=f32) + b_qkv   # (BT, 3GP)

            # Lane-aligned per-head Q/K/V blocks (offsets 0 / 128 / 256).
            q = qkv[:, 0:Dh].reshape(B, T, Dh)
            k = qkv[:, GP:GP + Dh].reshape(B, T, Dh)
            v = qkv[:, 2 * GP:2 * GP + Dh].reshape(B, T, Dh)

            s = jnp.einsum('bqd,bkd->bqk', q, k,
                           preferred_element_type=f32) * scale              # (B, T, T)
            s = s - s.max(axis=-1, keepdims=True)
            p = jnp.exp(s)
            p = p / p.sum(axis=-1, keepdims=True)      # exact divide (tolerance-critical)
            ctx = jnp.einsum('bqk,bkd->bqd', p, v,
                             preferred_element_type=f32)                    # (B, T, Dh)

            w_f = slab_ref[pl.ds(lay["wf"] + h * Dh, Dh), :]                # (Dh, 3GP)
            gates = gates + jnp.dot(ctx.reshape(B * T, Dh), w_f,
                                    preferred_element_type=f32)

        # ---------------- GRU recurrence ----------------
        # Per-step gate fetches hoisted; they carry no h_state dependency, so only the
        # (B,H)x(H,3GP) dot and the gate math sit on the serial chain.
        gates_bt = gates.reshape(B, T, G3)
        gx_steps = [gates_bt[:, t, :] for t in range(T)]

        whh = slab_ref[pl.ds(lay["whh"], H), :]                             # (H, 3GP)
        bhh = jnp.broadcast_to(slab_ref[pl.ds(lay["bhh"], 1), :], (B, G3))  # hoisted bcast

        h_state = jnp.zeros((B, H), f32)
        for t in range(T):  # unrolled at trace time (T is small)
            gx = gx_steps[t]
            gh = jnp.dot(h_state, whh, preferred_element_type=f32) + bhh
            # Every slice below starts on a 128-lane boundary -> data at lanes 0:H, so
            # r, z, n, h_state combine with no lane rotations on the serial chain.
            r = _sigmoid(gx[:, 0:H] + gh[:, 0:H])
            z = _sigmoid(gx[:, GP:GP + H] + gh[:, GP:GP + H])
            n = jnp.tanh(gx[:, 2 * GP:2 * GP + H] + r * gh[:, 2 * GP:2 * GP + H])
            h_state = (1.0 - z) * n + z * h_state

        # ---------------- classifier on last hidden state (lane-dense store) ---------
        wfc = slab_ref[pl.ds(lay["wfc"], H), :][:, 0:CP]                    # (H, 128)
        bfc = slab_ref[pl.ds(lay["bfc"], 1), :][:, 0:CP]                    # (1, 128)
        out_ref[...] = jnp.dot(h_state, wfc, preferred_element_type=f32) + bfc

    return kernel


def build_attention_rnn(B, T, E, H, num_classes, heads=NUM_HEADS):
    lay = _row_layout(E, H, heads)
    kernel = _make_kernel(B, T, E, H, heads, lay)

    @jax.jit
    def forward(x, slab):
        out_padded = pl.pallas_call(
            kernel,
            out_shape=jax.ShapeDtypeStruct((B, CP), jnp.float32),
            in_specs=[pl.BlockSpec(memory_space=pltpu.MemorySpace.VMEM),
                      pl.BlockSpec(memory_space=pltpu.MemorySpace.VMEM)],
            out_specs=pl.BlockSpec(memory_space=pltpu.MemorySpace.VMEM),
        )(x, slab)
        return out_padded[:, :num_classes]

    return forward


def reference_forward(x, p, heads=NUM_HEADS):
    """Pure-JAX reference mirroring MultiheadAttention + GRU(batch_first) + fc."""
    B, T, E = x.shape
    H = p["whh"].shape[0]
    Dh = E // heads
    hp = jax.lax.Precision.HIGHEST

    qkv = jnp.dot(x, p["wqkv"], precision=hp) + p["bqkv"]                   # (B, T, 3E)
    q, k, v = qkv[..., :E], qkv[..., E:2 * E], qkv[..., 2 * E:]
    ctxs = []
    for h in range(heads):
        qh = q[..., h * Dh:(h + 1) * Dh]
        kh = k[..., h * Dh:(h + 1) * Dh]
        vh = v[..., h * Dh:(h + 1) * Dh]
        s = jnp.einsum('bqd,bkd->bqk', qh, kh, precision=hp) / math.sqrt(Dh)
        a = jax.nn.softmax(s, axis=-1)
        ctxs.append(jnp.einsum('bqk,bkd->bqd', a, vh, precision=hp))
    ctx = jnp.concatenate(ctxs, axis=-1)                                    # (B, T, E)
    attn = jnp.dot(ctx, p["wout"], precision=hp) + p["bout"]

    def step(h_state, x_t):
        gx = jnp.dot(x_t, p["wih"], precision=hp) + p["bih"]
        gh = jnp.dot(h_state, p["whh"], precision=hp) + p["bhh"]
        r = _sigmoid(gx[:, :H] + gh[:, :H])
        z = _sigmoid(gx[:, H:2 * H] + gh[:, H:2 * H])
        n = jnp.tanh(gx[:, 2 * H:] + r * gh[:, 2 * H:])
        return (1.0 - z) * n + z * h_state, None

    h_last, _ = jax.lax.scan(step, jnp.zeros((B, H), jnp.float32),
                             jnp.transpose(attn, (1, 0, 2)))
    return jnp.dot(h_last, p["wfc"], precision=hp) + p["bfc"]


if __name__ == "__main__":
    # AttentionRNN(input_dim, attention_dim, rnn_hidden_size, num_classes)
    B, T = 2, 8
    INPUT_DIM = 32          # embed dim; must be divisible by the 2 attention heads
    ATTENTION_DIM = 64      # accepted by the PyTorch module but never used in forward
    RNN_HIDDEN = 32
    NUM_CLASSES = 10

    key = jax.random.PRNGKey(0)
    k_x, k_p = jax.random.split(key)
    x = jax.random.normal(k_x, (B, T, INPUT_DIM), dtype=jnp.float32)
    params = init_params(k_p, INPUT_DIM, RNN_HIDDEN, NUM_CLASSES)
    slab = pack_params(params)

    forward = build_attention_rnn(B, T, INPUT_DIM, RNN_HIDDEN, NUM_CLASSES)
    out = jax.block_until_ready(forward(x, slab))

    ref = reference_forward(x, params)
    assert out.shape == (B, NUM_CLASSES), out.shape
    err = float(jnp.max(jnp.abs(out - ref)))
    assert jnp.allclose(out, ref, atol=2e-4, rtol=2e-4), (
        f"mismatch vs pure-JAX reference: max abs err {err}")

    print("KERNEL_OK")
</pallas_src>

<mosaic_0001>
module attributes {stable_mosaic.version = 11 : i64} {
  func.func @kernel(%arg0: memref<2x8x32xf32, #tpu.memory_space<vmem>>, %arg1: memref<200x384xf32, #tpu.memory_space<vmem>>, %arg2: memref<2x128xf32, #tpu.memory_space<vmem>>) attributes {dimension_semantics = [], scalar_prefetch = 0 : i64, scratch_operands = 0 : i64, tpu.core_type = #tpu.core_type<tc>} {
    %c0 = arith.constant 0 : index
    %c0_0 = arith.constant 0 : index
    %c0_1 = arith.constant 0 : index
    %0 = vector.load %arg0[%c0, %c0_0, %c0_1] : memref<2x8x32xf32, #tpu.memory_space<vmem>>, vector<2x8x32xf32>
    %1 = vector.shape_cast %0 : vector<2x8x32xf32> to vector<16x32xf32>
    %c112 = arith.constant 112 : index
    %c0_2 = arith.constant 0 : index
    %2 = vector.load %arg1[%c112, %c0_2] : memref<200x384xf32, #tpu.memory_space<vmem>>, vector<1x384xf32>
    %3 = vector.shape_cast %2 : vector<1x384xf32> to vector<1x384xf32>
    %4 = vector.broadcast %3 : vector<1x384xf32> to vector<16x384xf32>
    %c0_3 = arith.constant 0 : index
    %c0_4 = arith.constant 0 : index
    %5 = vector.load %arg1[%c0_3, %c0_4] : memref<200x384xf32, #tpu.memory_space<vmem>>, vector<32x384xf32>
    %c64 = arith.constant 64 : index
    %c0_5 = arith.constant 0 : index
    %6 = vector.load %arg1[%c64, %c0_5] : memref<200x384xf32, #tpu.memory_space<vmem>>, vector<1x384xf32>
    %cst = arith.constant dense<0.000000e+00> : vector<16x384xf32>
    %7 = tpu.matmul %1, %5, %cst {dimension_numbers = #tpu.dot_dimension_numbers<[1], [0], [0], [1], [0, 0, 1, 1], [], []>} : vector<16x32xf32>, vector<32x384xf32>, vector<16x384xf32> -> vector<16x384xf32>
    %8 = vector.broadcast %6 : vector<1x384xf32> to vector<16x384xf32>
    %9 = arith.addf %7, %8 : vector<16x384xf32>
    %10 = vector.extract_strided_slice %9 {offsets = [0, 0], sizes = [16, 16], strides = [1, 1]} : vector<16x384xf32> to vector<16x16xf32>
    %11 = vector.shape_cast %10 : vector<16x16xf32> to vector<2x8x16xf32>
    %12 = vector.extract_strided_slice %9 {offsets = [0, 128], sizes = [16, 16], strides = [1, 1]} : vector<16x384xf32> to vector<16x16xf32>
    %13 = vector.shape_cast %12 : vector<16x16xf32> to vector<2x8x16xf32>
    %14 = vector.extract_strided_slice %9 {offsets = [0, 256], sizes = [16, 16], strides = [1, 1]} : vector<16x384xf32> to vector<16x16xf32>
    %15 = vector.shape_cast %14 : vector<16x16xf32> to vector<2x8x16xf32>
    "tpu.trace_start"() <{level = 10 : i32, message = "bqd,bkd->bqk"}> : () -> ()
    %cst_6 = arith.constant dense<0.000000e+00> : vector<2x8x8xf32>
    %16 = tpu.matmul %11, %13, %cst_6 {dimension_numbers = #tpu.dot_dimension_numbers<[2], [2], [1], [1], [0, 0, 0, 1, 1, 1], [0], [0]>} : vector<2x8x16xf32>, vector<2x8x16xf32>, vector<2x8x8xf32> -> vector<2x8x8xf32>
    "tpu.trace_stop"() : () -> ()
    %cst_7 = arith.constant 2.500000e-01 : f32
    %17 = vector.broadcast %cst_7 : f32 to vector<2x8x8xf32>
    %18 = arith.mulf %16, %17 : vector<2x8x8xf32>
    %cst_8 = arith.constant dense<0xFF800000> : vector<2x8xf32>
    %19 = vector.multi_reduction <maximumf>, %18, %cst_8 [2] : vector<2x8x8xf32> to vector<2x8xf32>
    %20 = vector.shape_cast %19 : vector<2x8xf32> to vector<2x8x1xf32>
    %21 = vector.broadcast %20 : vector<2x8x1xf32> to vector<2x8x8xf32>
    %22 = arith.subf %18, %21 : vector<2x8x8xf32>
    %23 = math.exp %22 : vector<2x8x8xf32>
    %cst_9 = arith.constant dense<0.000000e+00> : vector<2x8xf32>
    %24 = vector.multi_reduction <add>, %23, %cst_9 [2] : vector<2x8x8xf32> to vector<2x8xf32>
    %25 = vector.shape_cast %24 : vector<2x8xf32> to vector<2x8x1xf32>
    %26 = vector.broadcast %25 : vector<2x8x1xf32> to vector<2x8x8xf32>
    %27 = arith.divf %23, %26 : vector<2x8x8xf32>
    "tpu.trace_start"() <{level = 10 : i32, message = "bqk,bkd->bqd"}> : () -> ()
    %cst_10 = arith.constant dense<0.000000e+00> : vector<2x8x16xf32>
    %28 = tpu.matmul %27, %15, %cst_10 {dimension_numbers = #tpu.dot_dimension_numbers<[2], [1], [1], [2], [0, 0, 0, 1, 1, 2], [0], [0]>} : vector<2x8x8xf32>, vector<2x8x16xf32>, vector<2x8x16xf32> -> vector<2x8x16xf32>
    "tpu.trace_stop"() : () -> ()
    %c80 = arith.constant 80 : index
    %c0_11 = arith.constant 0 : index
    %29 = vector.load %arg1[%c80, %c0_11] : memref<200x384xf32, #tpu.memory_space<vmem>>, vector<16x384xf32>
    %30 = vector.shape_cast %28 : vector<2x8x16xf32> to vector<16x16xf32>
    %cst_12 = arith.constant dense<0.000000e+00> : vector<16x384xf32>
    %31 = tpu.matmul %30, %29, %cst_12 {dimension_numbers = #tpu.dot_dimension_numbers<[1], [0], [0], [1], [0, 0, 1, 1], [], []>} : vector<16x16xf32>, vector<16x384xf32>, vector<16x384xf32> -> vector<16x384xf32>
    %32 = arith.addf %4, %31 : vector<16x384xf32>
    %c32 = arith.constant 32 : index
    %c0_13 = arith.constant 0 : index
    %33 = vector.load %arg1[%c32, %c0_13] : memref<200x384xf32, #tpu.memory_space<vmem>>, vector<32x384xf32>
    %c72 = arith.constant 72 : index
    %c0_14 = arith.constant 0 : index
    %34 = vector.load %arg1[%c72, %c0_14] : memref<200x384xf32, #tpu.memory_space<vmem>>, vector<1x384xf32>
    %cst_15 = arith.constant dense<0.000000e+00> : vector<16x384xf32>
    %35 = tpu.matmul %1, %33, %cst_15 {dimension_numbers = #tpu.dot_dimension_numbers<[1], [0], [0], [1], [0, 0, 1, 1], [], []>} : vector<16x32xf32>, vector<32x384xf32>, vector<16x384xf32> -> vector<16x384xf32>
    %36 = vector.broadcast %34 : vector<1x384xf32> to vector<16x384xf32>
    %37 = arith.addf %35, %36 : vector<16x384xf32>
    %38 = vector.extract_strided_slice %37 {offsets = [0, 0], sizes = [16, 16], strides = [1, 1]} : vector<16x384xf32> to vector<16x16xf32>
    %39 = vector.shape_cast %38 : vector<16x16xf32> to vector<2x8x16xf32>
    %40 = vector.extract_strided_slice %37 {offsets = [0, 128], sizes = [16, 16], strides = [1, 1]} : vector<16x384xf32> to vector<16x16xf32>
    %41 = vector.shape_cast %40 : vector<16x16xf32> to vector<2x8x16xf32>
    %42 = vector.extract_strided_slice %37 {offsets = [0, 256], sizes = [16, 16], strides = [1, 1]} : vector<16x384xf32> to vector<16x16xf32>
    %43 = vector.shape_cast %42 : vector<16x16xf32> to vector<2x8x16xf32>
    "tpu.trace_start"() <{level = 10 : i32, message = "bqd,bkd->bqk"}> : () -> ()
    %cst_16 = arith.constant dense<0.000000e+00> : vector<2x8x8xf32>
    %44 = tpu.matmul %39, %41, %cst_16 {dimension_numbers = #tpu.dot_dimension_numbers<[2], [2], [1], [1], [0, 0, 0, 1, 1, 1], [0], [0]>} : vector<2x8x16xf32>, vector<2x8x16xf32>, vector<2x8x8xf32> -> vector<2x8x8xf32>
    "tpu.trace_stop"() : () -> ()
    %cst_17 = arith.constant 2.500000e-01 : f32
    %45 = vector.broadcast %cst_17 : f32 to vector<2x8x8xf32>
    %46 = arith.mulf %44, %45 : vector<2x8x8xf32>
    %cst_18 = arith.constant dense<0xFF800000> : vector<2x8xf32>
    %47 = vector.multi_reduction <maximumf>, %46, %cst_18 [2] : vector<2x8x8xf32> to vector<2x8xf32>
    %48 = vector.shape_cast %47 : vector<2x8xf32> to vector<2x8x1xf32>
    %49 = vector.broadcast %48 : vector<2x8x1xf32> to vector<2x8x8xf32>
    %50 = arith.subf %46, %49 : vector<2x8x8xf32>
    %51 = math.exp %50 : vector<2x8x8xf32>
    %cst_19 = arith.constant dense<0.000000e+00> : vector<2x8xf32>
    %52 = vector.multi_reduction <add>, %51, %cst_19 [2] : vector<2x8x8xf32> to vector<2x8xf32>
    %53 = vector.shape_cast %52 : vector<2x8xf32> to vector<2x8x1xf32>
    %54 = vector.broadcast %53 : vector<2x8x1xf32> to vector<2x8x8xf32>
    %55 = arith.divf %51, %54 : vector<2x8x8xf32>
    "tpu.trace_start"() <{level = 10 : i32, message = "bqk,bkd->bqd"}> : () -> ()
    %cst_20 = arith.constant dense<0.000000e+00> : vector<2x8x16xf32>
    %56 = tpu.matmul %55, %43, %cst_20 {dimension_numbers = #tpu.dot_dimension_numbers<[2], [1], [1], [2], [0, 0, 0, 1, 1, 2], [0], [0]>} : vector<2x8x8xf32>, vector<2x8x16xf32>, vector<2x8x16xf32> -> vector<2x8x16xf32>
    "tpu.trace_stop"() : () -> ()
    %c96 = arith.constant 96 : index
    %c0_21 = arith.constant 0 : index
    %57 = vector.load %arg1[%c96, %c0_21] : memref<200x384xf32, #tpu.memory_space<vmem>>, vector<16x384xf32>
    %58 = vector.shape_cast %56 : vector<2x8x16xf32> to vector<16x16xf32>
    %cst_22 = arith.constant dense<0.000000e+00> : vector<16x384xf32>
    %59 = tpu.matmul %58, %57, %cst_22 {dimension_numbers = #tpu.dot_dimension_numbers<[1], [0], [0], [1], [0, 0, 1, 1], [], []>} : vector<16x16xf32>, vector<16x384xf32>, vector<16x384xf32> -> vector<16x384xf32>
    %60 = arith.addf %32, %59 : vector<16x384xf32>
    %61 = vector.shape_cast %60 : vector<16x384xf32> to vector<2x8x384xf32>
    %62 = vector.extract_strided_slice %61 {offsets = [0, 0, 0], sizes = [2, 1, 384], strides = [1, 1, 1]} : vector<2x8x384xf32> to vector<2x1x384xf32>
    %63 = vector.shape_cast %62 : vector<2x1x384xf32> to vector<2x384xf32>
    %64 = vector.extract_strided_slice %61 {offsets = [0, 1, 0], sizes = [2, 1, 384], strides = [1, 1, 1]} : vector<2x8x384xf32> to vector<2x1x384xf32>
    %65 = vector.shape_cast %64 : vector<2x1x384xf32> to vector<2x384xf32>
    %66 = vector.extract_strided_slice %61 {offsets = [0, 2, 0], sizes = [2, 1, 384], strides = [1, 1, 1]} : vector<2x8x384xf32> to vector<2x1x384xf32>
    %67 = vector.shape_cast %66 : vector<2x1x384xf32> to vector<2x384xf32>
    %68 = vector.extract_strided_slice %61 {offsets = [0, 3, 0], sizes = [2, 1, 384], strides = [1, 1, 1]} : vector<2x8x384xf32> to vector<2x1x384xf32>
    %69 = vector.shape_cast %68 : vector<2x1x384xf32> to vector<2x384xf32>
    %70 = vector.extract_strided_slice %61 {offsets = [0, 4, 0], sizes = [2, 1, 384], strides = [1, 1, 1]} : vector<2x8x384xf32> to vector<2x1x384xf32>
    %71 = vector.shape_cast %70 : vector<2x1x384xf32> to vector<2x384xf32>
    %72 = vector.extract_strided_slice %61 {offsets = [0, 5, 0], sizes = [2, 1, 384], strides = [1, 1, 1]} : vector<2x8x384xf32> to vector<2x1x384xf32>
    %73 = vector.shape_cast %72 : vector<2x1x384xf32> to vector<2x384xf32>
    %74 = vector.extract_strided_slice %61 {offsets = [0, 6, 0], sizes = [2, 1, 384], strides = [1, 1, 1]} : vector<2x8x384xf32> to vector<2x1x384xf32>
    %75 = vector.shape_cast %74 : vector<2x1x384xf32> to vector<2x384xf32>
    %76 = vector.extract_strided_slice %61 {offsets = [0, 7, 0], sizes = [2, 1, 384], strides = [1, 1, 1]} : vector<2x8x384xf32> to vector<2x1x384xf32>
    %77 = vector.shape_cast %76 : vector<2x1x384xf32> to vector<2x384xf32>
    %c120 = arith.constant 120 : index
    %c0_23 = arith.constant 0 : index
    %78 = vector.load %arg1[%c120, %c0_23] : memref<200x384xf32, #tpu.memory_space<vmem>>, vector<32x384xf32>
    %c152 = arith.constant 152 : index
    %c0_24 = arith.constant 0 : index
    %79 = vector.load %arg1[%c152, %c0_24] : memref<200x384xf32, #tpu.memory_space<vmem>>, vector<1x384xf32>
    %80 = vector.shape_cast %79 : vector<1x384xf32> to vector<1x384xf32>
    %81 = vector.broadcast %80 : vector<1x384xf32> to vector<2x384xf32>
    %cst_25 = arith.constant 0.000000e+00 : f32
    %82 = vector.broadcast %cst_25 : f32 to vector<2x32xf32>
    %cst_26 = arith.constant dense<0.000000e+00> : vector<2x384xf32>
    %83 = tpu.matmul %82, %78, %cst_26 {dimension_numbers = #tpu.dot_dimension_numbers<[1], [0], [0], [1], [0, 0, 1, 1], [], []>} : vector<2x32xf32>, vector<32x384xf32>, vector<2x384xf32> -> vector<2x384xf32>
    %84 = arith.addf %83, %81 : vector<2x384xf32>
    %85 = vector.extract_strided_slice %63 {offsets = [0, 0], sizes = [2, 32], strides = [1, 1]} : vector<2x384xf32> to vector<2x32xf32>
    %86 = vector.extract_strided_slice %84 {offsets = [0, 0], sizes = [2, 32], strides = [1, 1]} : vector<2x384xf32> to vector<2x32xf32>
    %87 = arith.addf %85, %86 : vector<2x32xf32>
    %cst_27 = arith.constant 0.000000e+00 : f32
    %88 = vector.broadcast %cst_27 : f32 to vector<2x32xf32>
    %89 = arith.subf %88, %87 : vector<2x32xf32>
    %90 = math.exp %89 : vector<2x32xf32>
    %cst_28 = arith.constant 1.000000e+00 : f32
    %91 = vector.broadcast %cst_28 : f32 to vector<2x32xf32>
    %92 = arith.addf %91, %90 : vector<2x32xf32>
    %cst_29 = arith.constant 1.000000e+00 : f32
    %93 = vector.broadcast %cst_29 : f32 to vector<2x32xf32>
    %94 = arith.divf %93, %92 : vector<2x32xf32>
    %95 = vector.extract_strided_slice %63 {offsets = [0, 128], sizes = [2, 32], strides = [1, 1]} : vector<2x384xf32> to vector<2x32xf32>
    %96 = vector.extract_strided_slice %84 {offsets = [0, 128], sizes = [2, 32], strides = [1, 1]} : vector<2x384xf32> to vector<2x32xf32>
    %97 = arith.addf %95, %96 : vector<2x32xf32>
    %cst_30 = arith.constant 0.000000e+00 : f32
    %98 = vector.broadcast %cst_30 : f32 to vector<2x32xf32>
    %99 = arith.subf %98, %97 : vector<2x32xf32>
    %100 = math.exp %99 : vector<2x32xf32>
    %cst_31 = arith.constant 1.000000e+00 : f32
    %101 = vector.broadcast %cst_31 : f32 to vector<2x32xf32>
    %102 = arith.addf %101, %100 : vector<2x32xf32>
    %cst_32 = arith.constant 1.000000e+00 : f32
    %103 = vector.broadcast %cst_32 : f32 to vector<2x32xf32>
    %104 = arith.divf %103, %102 : vector<2x32xf32>
    %105 = vector.extract_strided_slice %63 {offsets = [0, 256], sizes = [2, 32], strides = [1, 1]} : vector<2x384xf32> to vector<2x32xf32>
    %106 = vector.extract_strided_slice %84 {offsets = [0, 256], sizes = [2, 32], strides = [1, 1]} : vector<2x384xf32> to vector<2x32xf32>
    %107 = arith.mulf %94, %106 : vector<2x32xf32>
    %108 = arith.addf %105, %107 : vector<2x32xf32>
    %109 = math.tanh %108 : vector<2x32xf32>
    %cst_33 = arith.constant 1.000000e+00 : f32
    %110 = vector.broadcast %cst_33 : f32 to vector<2x32xf32>
    %111 = arith.subf %110, %104 : vector<2x32xf32>
    %112 = arith.mulf %111, %109 : vector<2x32xf32>
    %113 = arith.mulf %104, %82 : vector<2x32xf32>
    %114 = arith.addf %112, %113 : vector<2x32xf32>
    %cst_34 = arith.constant dense<0.000000e+00> : vector<2x384xf32>
    %115 = tpu.matmul %114, %78, %cst_34 {dimension_numbers = #tpu.dot_dimension_numbers<[1], [0], [0], [1], [0, 0, 1, 1], [], []>} : vector<2x32xf32>, vector<32x384xf32>, vector<2x384xf32> -> vector<2x384xf32>
    %116 = arith.addf %115, %81 : vector<2x384xf32>
    %117 = vector.extract_strided_slice %65 {offsets = [0, 0], sizes = [2, 32], strides = [1, 1]} : vector<2x384xf32> to vector<2x32xf32>
    %118 = vector.extract_strided_slice %116 {offsets = [0, 0], sizes = [2, 32], strides = [1, 1]} : vector<2x384xf32> to vector<2x32xf32>
    %119 = arith.addf %117, %118 : vector<2x32xf32>
    %cst_35 = arith.constant 0.000000e+00 : f32
    %120 = vector.broadcast %cst_35 : f32 to vector<2x32xf32>
    %121 = arith.subf %120, %119 : vector<2x32xf32>
    %122 = math.exp %121 : vector<2x32xf32>
    %cst_36 = arith.constant 1.000000e+00 : f32
    %123 = vector.broadcast %cst_36 : f32 to vector<2x32xf32>
    %124 = arith.addf %123, %122 : vector<2x32xf32>
    %cst_37 = arith.constant 1.000000e+00 : f32
    %125 = vector.broadcast %cst_37 : f32 to vector<2x32xf32>
    %126 = arith.divf %125, %124 : vector<2x32xf32>
    %127 = vector.extract_strided_slice %65 {offsets = [0, 128], sizes = [2, 32], strides = [1, 1]} : vector<2x384xf32> to vector<2x32xf32>
    %128 = vector.extract_strided_slice %116 {offsets = [0, 128], sizes = [2, 32], strides = [1, 1]} : vector<2x384xf32> to vector<2x32xf32>
    %129 = arith.addf %127, %128 : vector<2x32xf32>
    %cst_38 = arith.constant 0.000000e+00 : f32
    %130 = vector.broadcast %cst_38 : f32 to vector<2x32xf32>
    %131 = arith.subf %130, %129 : vector<2x32xf32>
    %132 = math.exp %131 : vector<2x32xf32>
    %cst_39 = arith.constant 1.000000e+00 : f32
    %133 = vector.broadcast %cst_39 : f32 to vector<2x32xf32>
    %134 = arith.addf %133, %132 : vector<2x32xf32>
    %cst_40 = arith.constant 1.000000e+00 : f32
    %135 = vector.broadcast %cst_40 : f32 to vector<2x32xf32>
    %136 = arith.divf %135, %134 : vector<2x32xf32>
    %137 = vector.extract_strided_slice %65 {offsets = [0, 256], sizes = [2, 32], strides = [1, 1]} : vector<2x384xf32> to vector<2x32xf32>
    %138 = vector.extract_strided_slice %116 {offsets = [0, 256], sizes = [2, 32], strides = [1, 1]} : vector<2x384xf32> to vector<2x32xf32>
    %139 = arith.mulf %126, %138 : vector<2x32xf32>
    %140 = arith.addf %137, %139 : vector<2x32xf32>
    %141 = math.tanh %140 : vector<2x32xf32>
    %cst_41 = arith.constant 1.000000e+00 : f32
    %142 = vector.broadcast %cst_41 : f32 to vector<2x32xf32>
    %143 = arith.subf %142, %136 : vector<2x32xf32>
    %144 = arith.mulf %143, %141 : vector<2x32xf32>
    %145 = arith.mulf %136, %114 : vector<2x32xf32>
    %146 = arith.addf %144, %145 : vector<2x32xf32>
    %cst_42 = arith.constant dense<0.000000e+00> : vector<2x384xf32>
    %147 = tpu.matmul %146, %78, %cst_42 {dimension_numbers = #tpu.dot_dimension_numbers<[1], [0], [0], [1], [0, 0, 1, 1], [], []>} : vector<2x32xf32>, vector<32x384xf32>, vector<2x384xf32> -> vector<2x384xf32>
    %148 = arith.addf %147, %81 : vector<2x384xf32>
    %149 = vector.extract_strided_slice %67 {offsets = [0, 0], sizes = [2, 32], strides = [1, 1]} : vector<2x384xf32> to vector<2x32xf32>
    %150 = vector.extract_strided_slice %148 {offsets = [0, 0], sizes = [2, 32], strides = [1, 1]} : vector<2x384xf32> to vector<2x32xf32>
    %151 = arith.addf %149, %150 : vector<2x32xf32>
    %cst_43 = arith.constant 0.000000e+00 : f32
    %152 = vector.broadcast %cst_43 : f32 to vector<2x32xf32>
    %153 = arith.subf %152, %151 : vector<2x32xf32>
    %154 = math.exp %153 : vector<2x32xf32>
    %cst_44 = arith.constant 1.000000e+00 : f32
    %155 = vector.broadcast %cst_44 : f32 to vector<2x32xf32>
    %156 = arith.addf %155, %154 : vector<2x32xf32>
    %cst_45 = arith.constant 1.000000e+00 : f32
    %157 = vector.broadcast %cst_45 : f32 to vector<2x32xf32>
    %158 = arith.divf %157, %156 : vector<2x32xf32>
    %159 = vector.extract_strided_slice %67 {offsets = [0, 128], sizes = [2, 32], strides = [1, 1]} : vector<2x384xf32> to vector<2x32xf32>
    %160 = vector.extract_strided_slice %148 {offsets = [0, 128], sizes = [2, 32], strides = [1, 1]} : vector<2x384xf32> to vector<2x32xf32>
    %161 = arith.addf %159, %160 : vector<2x32xf32>
    %cst_46 = arith.constant 0.000000e+00 : f32
    %162 = vector.broadcast %cst_46 : f32 to vector<2x32xf32>
    %163 = arith.subf %162, %161 : vector<2x32xf32>
    %164 = math.exp %163 : vector<2x32xf32>
    %cst_47 = arith.constant 1.000000e+00 : f32
    %165 = vector.broadcast %cst_47 : f32 to vector<2x32xf32>
    %166 = arith.addf %165, %164 : vector<2x32xf32>
    %cst_48 = arith.constant 1.000000e+00 : f32
    %167 = vector.broadcast %cst_48 : f32 to vector<2x32xf32>
    %168 = arith.divf %167, %166 : vector<2x32xf32>
    %169 = vector.extract_strided_slice %67 {offsets = [0, 256], sizes = [2, 32], strides = [1, 1]} : vector<2x384xf32> to vector<2x32xf32>
    %170 = vector.extract_strided_slice %148 {offsets = [0, 256], sizes = [2, 32], strides = [1, 1]} : vector<2x384xf32> to vector<2x32xf32>
    %171 = arith.mulf %158, %170 : vector<2x32xf32>
    %172 = arith.addf %169, %171 : vector<2x32xf32>
    %173 = math.tanh %172 : vector<2x32xf32>
    %cst_49 = arith.constant 1.000000e+00 : f32
    %174 = vector.broadcast %cst_49 : f32 to vector<2x32xf32>
    %175 = arith.subf %174, %168 : vector<2x32xf32>
    %176 = arith.mulf %175, %173 : vector<2x32xf32>
    %177 = arith.mulf %168, %146 : vector<2x32xf32>
    %178 = arith.addf %176, %177 : vector<2x32xf32>
    %cst_50 = arith.constant dense<0.000000e+00> : vector<2x384xf32>
    %179 = tpu.matmul %178, %78, %cst_50 {dimension_numbers = #tpu.dot_dimension_numbers<[1], [0], [0], [1], [0, 0, 1, 1], [], []>} : vector<2x32xf32>, vector<32x384xf32>, vector<2x384xf32> -> vector<2x384xf32>
    %180 = arith.addf %179, %81 : vector<2x384xf32>
    %181 = vector.extract_strided_slice %69 {offsets = [0, 0], sizes = [2, 32], strides = [1, 1]} : vector<2x384xf32> to vector<2x32xf32>
    %182 = vector.extract_strided_slice %180 {offsets = [0, 0], sizes = [2, 32], strides = [1, 1]} : vector<2x384xf32> to vector<2x32xf32>
    %183 = arith.addf %181, %182 : vector<2x32xf32>
    %cst_51 = arith.constant 0.000000e+00 : f32
    %184 = vector.broadcast %cst_51 : f32 to vector<2x32xf32>
    %185 = arith.subf %184, %183 : vector<2x32xf32>
    %186 = math.exp %185 : vector<2x32xf32>
    %cst_52 = arith.constant 1.000000e+00 : f32
    %187 = vector.broadcast %cst_52 : f32 to vector<2x32xf32>
    %188 = arith.addf %187, %186 : vector<2x32xf32>
    %cst_53 = arith.constant 1.000000e+00 : f32
    %189 = vector.broadcast %cst_53 : f32 to vector<2x32xf32>
    %190 = arith.divf %189, %188 : vector<2x32xf32>
    %191 = vector.extract_strided_slice %69 {offsets = [0, 128], sizes = [2, 32], strides = [1, 1]} : vector<2x384xf32> to vector<2x32xf32>
    %192 = vector.extract_strided_slice %180 {offsets = [0, 128], sizes = [2, 32], strides = [1, 1]} : vector<2x384xf32> to vector<2x32xf32>
    %193 = arith.addf %191, %192 : vector<2x32xf32>
    %cst_54 = arith.constant 0.000000e+00 : f32
    %194 = vector.broadcast %cst_54 : f32 to vector<2x32xf32>
    %195 = arith.subf %194, %193 : vector<2x32xf32>
    %196 = math.exp %195 : vector<2x32xf32>
    %cst_55 = arith.constant 1.000000e+00 : f32
    %197 = vector.broadcast %cst_55 : f32 to vector<2x32xf32>
    %198 = arith.addf %197, %196 : vector<2x32xf32>
    %cst_56 = arith.constant 1.000000e+00 : f32
    %199 = vector.broadcast %cst_56 : f32 to vector<2x32xf32>
    %200 = arith.divf %199, %198 : vector<2x32xf32>
    %201 = vector.extract_strided_slice %69 {offsets = [0, 256], sizes = [2, 32], strides = [1, 1]} : vector<2x384xf32> to vector<2x32xf32>
    %202 = vector.extract_strided_slice %180 {offsets = [0, 256], sizes = [2, 32], strides = [1, 1]} : vector<2x384xf32> to vector<2x32xf32>
    %203 = arith.mulf %190, %202 : vector<2x32xf32>
    %204 = arith.addf %201, %203 : vector<2x32xf32>
    %205 = math.tanh %204 : vector<2x32xf32>
    %cst_57 = arith.constant 1.000000e+00 : f32
    %206 = vector.broadcast %cst_57 : f32 to vector<2x32xf32>
    %207 = arith.subf %206, %200 : vector<2x32xf32>
    %208 = arith.mulf %207, %205 : vector<2x32xf32>
    %209 = arith.mulf %200, %178 : vector<2x32xf32>
    %210 = arith.addf %208, %209 : vector<2x32xf32>
    %cst_58 = arith.constant dense<0.000000e+00> : vector<2x384xf32>
    %211 = tpu.matmul %210, %78, %cst_58 {dimension_numbers = #tpu.dot_dimension_numbers<[1], [0], [0], [1], [0, 0, 1, 1], [], []>} : vector<2x32xf32>, vector<32x384xf32>, vector<2x384xf32> -> vector<2x384xf32>
    %212 = arith.addf %211, %81 : vector<2x384xf32>
    %213 = vector.extract_strided_slice %71 {offsets = [0, 0], sizes = [2, 32], strides = [1, 1]} : vector<2x384xf32> to vector<2x32xf32>
    %214 = vector.extract_strided_slice %212 {offsets = [0, 0], sizes = [2, 32], strides = [1, 1]} : vector<2x384xf32> to vector<2x32xf32>
    %215 = arith.addf %213, %214 : vector<2x32xf32>
    %cst_59 = arith.constant 0.000000e+00 : f32
    %216 = vector.broadcast %cst_59 : f32 to vector<2x32xf32>
    %217 = arith.subf %216, %215 : vector<2x32xf32>
    %218 = math.exp %217 : vector<2x32xf32>
    %cst_60 = arith.constant 1.000000e+00 : f32
    %219 = vector.broadcast %cst_60 : f32 to vector<2x32xf32>
    %220 = arith.addf %219, %218 : vector<2x32xf32>
    %cst_61 = arith.constant 1.000000e+00 : f32
    %221 = vector.broadcast %cst_61 : f32 to vector<2x32xf32>
    %222 = arith.divf %221, %220 : vector<2x32xf32>
    %223 = vector.extract_strided_slice %71 {offsets = [0, 128], sizes = [2, 32], strides = [1, 1]} : vector<2x384xf32> to vector<2x32xf32>
    %224 = vector.extract_strided_slice %212 {offsets = [0, 128], sizes = [2, 32], strides = [1, 1]} : vector<2x384xf32> to vector<2x32xf32>
    %225 = arith.addf %223, %224 : vector<2x32xf32>
    %cst_62 = arith.constant 0.000000e+00 : f32
    %226 = vector.broadcast %cst_62 : f32 to vector<2x32xf32>
    %227 = arith.subf %226, %225 : vector<2x32xf32>
    %228 = math.exp %227 : vector<2x32xf32>
    %cst_63 = arith.constant 1.000000e+00 : f32
    %229 = vector.broadcast %cst_63 : f32 to vector<2x32xf32>
    %230 = arith.addf %229, %228 : vector<2x32xf32>
    %cst_64 = arith.constant 1.000000e+00 : f32
    %231 = vector.broadcast %cst_64 : f32 to vector<2x32xf32>
    %232 = arith.divf %231, %230 : vector<2x32xf32>
    %233 = vector.extract_strided_slice %71 {offsets = [0, 256], sizes = [2, 32], strides = [1, 1]} : vector<2x384xf32> to vector<2x32xf32>
    %234 = vector.extract_strided_slice %212 {offsets = [0, 256], sizes = [2, 32], strides = [1, 1]} : vector<2x384xf32> to vector<2x32xf32>
    %235 = arith.mulf %222, %234 : vector<2x32xf32>
    %236 = arith.addf %233, %235 : vector<2x32xf32>
    %237 = math.tanh %236 : vector<2x32xf32>
    %cst_65 = arith.constant 1.000000e+00 : f32
    %238 = vector.broadcast %cst_65 : f32 to vector<2x32xf32>
    %239 = arith.subf %238, %232 : vector<2x32xf32>
    %240 = arith.mulf %239, %237 : vector<2x32xf32>
    %241 = arith.mulf %232, %210 : vector<2x32xf32>
    %242 = arith.addf %240, %241 : vector<2x32xf32>
    %cst_66 = arith.constant dense<0.000000e+00> : vector<2x384xf32>
    %243 = tpu.matmul %242, %78, %cst_66 {dimension_numbers = #tpu.dot_dimension_numbers<[1], [0], [0], [1], [0, 0, 1, 1], [], []>} : vector<2x32xf32>, vector<32x384xf32>, vector<2x384xf32> -> vector<2x384xf32>
    %244 = arith.addf %243, %81 : vector<2x384xf32>
    %245 = vector.extract_strided_slice %73 {offsets = [0, 0], sizes = [2, 32], strides = [1, 1]} : vector<2x384xf32> to vector<2x32xf32>
    %246 = vector.extract_strided_slice %244 {offsets = [0, 0], sizes = [2, 32], strides = [1, 1]} : vector<2x384xf32> to vector<2x32xf32>
    %247 = arith.addf %245, %246 : vector<2x32xf32>
    %cst_67 = arith.constant 0.000000e+00 : f32
    %248 = vector.broadcast %cst_67 : f32 to vector<2x32xf32>
    %249 = arith.subf %248, %247 : vector<2x32xf32>
    %250 = math.exp %249 : vector<2x32xf32>
    %cst_68 = arith.constant 1.000000e+00 : f32
    %251 = vector.broadcast %cst_68 : f32 to vector<2x32xf32>
    %252 = arith.addf %251, %250 : vector<2x32xf32>
    %cst_69 = arith.constant 1.000000e+00 : f32
    %253 = vector.broadcast %cst_69 : f32 to vector<2x32xf32>
    %254 = arith.divf %253, %252 : vector<2x32xf32>
    %255 = vector.extract_strided_slice %73 {offsets = [0, 128], sizes = [2, 32], strides = [1, 1]} : vector<2x384xf32> to vector<2x32xf32>
    %256 = vector.extract_strided_slice %244 {offsets = [0, 128], sizes = [2, 32], strides = [1, 1]} : vector<2x384xf32> to vector<2x32xf32>
    %257 = arith.addf %255, %256 : vector<2x32xf32>
    %cst_70 = arith.constant 0.000000e+00 : f32
    %258 = vector.broadcast %cst_70 : f32 to vector<2x32xf32>
    %259 = arith.subf %258, %257 : vector<2x32xf32>
    %260 = math.exp %259 : vector<2x32xf32>
    %cst_71 = arith.constant 1.000000e+00 : f32
    %261 = vector.broadcast %cst_71 : f32 to vector<2x32xf32>
    %262 = arith.addf %261, %260 : vector<2x32xf32>
    %cst_72 = arith.constant 1.000000e+00 : f32
    %263 = vector.broadcast %cst_72 : f32 to vector<2x32xf32>
    %264 = arith.divf %263, %262 : vector<2x32xf32>
    %265 = vector.extract_strided_slice %73 {offsets = [0, 256], sizes = [2, 32], strides = [1, 1]} : vector<2x384xf32> to vector<2x32xf32>
    %266 = vector.extract_strided_slice %244 {offsets = [0, 256], sizes = [2, 32], strides = [1, 1]} : vector<2x384xf32> to vector<2x32xf32>
    %267 = arith.mulf %254, %266 : vector<2x32xf32>
    %268 = arith.addf %265, %267 : vector<2x32xf32>
    %269 = math.tanh %268 : vector<2x32xf32>
    %cst_73 = arith.constant 1.000000e+00 : f32
    %270 = vector.broadcast %cst_73 : f32 to vector<2x32xf32>
    %271 = arith.subf %270, %264 : vector<2x32xf32>
    %272 = arith.mulf %271, %269 : vector<2x32xf32>
    %273 = arith.mulf %264, %242 : vector<2x32xf32>
    %274 = arith.addf %272, %273 : vector<2x32xf32>
    %cst_74 = arith.constant dense<0.000000e+00> : vector<2x384xf32>
    %275 = tpu.matmul %274, %78, %cst_74 {dimension_numbers = #tpu.dot_dimension_numbers<[1], [0], [0], [1], [0, 0, 1, 1], [], []>} : vector<2x32xf32>, vector<32x384xf32>, vector<2x384xf32> -> vector<2x384xf32>
    %276 = arith.addf %275, %81 : vector<2x384xf32>
    %277 = vector.extract_strided_slice %75 {offsets = [0, 0], sizes = [2, 32], strides = [1, 1]} : vector<2x384xf32> to vector<2x32xf32>
    %278 = vector.extract_strided_slice %276 {offsets = [0, 0], sizes = [2, 32], strides = [1, 1]} : vector<2x384xf32> to vector<2x32xf32>
    %279 = arith.addf %277, %278 : vector<2x32xf32>
    %cst_75 = arith.constant 0.000000e+00 : f32
    %280 = vector.broadcast %cst_75 : f32 to vector<2x32xf32>
    %281 = arith.subf %280, %279 : vector<2x32xf32>
    %282 = math.exp %281 : vector<2x32xf32>
    %cst_76 = arith.constant 1.000000e+00 : f32
    %283 = vector.broadcast %cst_76 : f32 to vector<2x32xf32>
    %284 = arith.addf %283, %282 : vector<2x32xf32>
    %cst_77 = arith.constant 1.000000e+00 : f32
    %285 = vector.broadcast %cst_77 : f32 to vector<2x32xf32>
    %286 = arith.divf %285, %284 : vector<2x32xf32>
    %287 = vector.extract_strided_slice %75 {offsets = [0, 128], sizes = [2, 32], strides = [1, 1]} : vector<2x384xf32> to vector<2x32xf32>
    %288 = vector.extract_strided_slice %276 {offsets = [0, 128], sizes = [2, 32], strides = [1, 1]} : vector<2x384xf32> to vector<2x32xf32>
    %289 = arith.addf %287, %288 : vector<2x32xf32>
    %cst_78 = arith.constant 0.000000e+00 : f32
    %290 = vector.broadcast %cst_78 : f32 to vector<2x32xf32>
    %291 = arith.subf %290, %289 : vector<2x32xf32>
    %292 = math.exp %291 : vector<2x32xf32>
    %cst_79 = arith.constant 1.000000e+00 : f32
    %293 = vector.broadcast %cst_79 : f32 to vector<2x32xf32>
    %294 = arith.addf %293, %292 : vector<2x32xf32>
    %cst_80 = arith.constant 1.000000e+00 : f32
    %295 = vector.broadcast %cst_80 : f32 to vector<2x32xf32>
    %296 = arith.divf %295, %294 : vector<2x32xf32>
    %297 = vector.extract_strided_slice %75 {offsets = [0, 256], sizes = [2, 32], strides = [1, 1]} : vector<2x384xf32> to vector<2x32xf32>
    %298 = vector.extract_strided_slice %276 {offsets = [0, 256], sizes = [2, 32], strides = [1, 1]} : vector<2x384xf32> to vector<2x32xf32>
    %299 = arith.mulf %286, %298 : vector<2x32xf32>
    %300 = arith.addf %297, %299 : vector<2x32xf32>
    %301 = math.tanh %300 : vector<2x32xf32>
    %cst_81 = arith.constant 1.000000e+00 : f32
    %302 = vector.broadcast %cst_81 : f32 to vector<2x32xf32>
    %303 = arith.subf %302, %296 : vector<2x32xf32>
    %304 = arith.mulf %303, %301 : vector<2x32xf32>
    %305 = arith.mulf %296, %274 : vector<2x32xf32>
    %306 = arith.addf %304, %305 : vector<2x32xf32>
    %cst_82 = arith.constant dense<0.000000e+00> : vector<2x384xf32>
    %307 = tpu.matmul %306, %78, %cst_82 {dimension_numbers = #tpu.dot_dimension_numbers<[1], [0], [0], [1], [0, 0, 1, 1], [], []>} : vector<2x32xf32>, vector<32x384xf32>, vector<2x384xf32> -> vector<2x384xf32>
    %308 = arith.addf %307, %81 : vector<2x384xf32>
    %309 = vector.extract_strided_slice %77 {offsets = [0, 0], sizes = [2, 32], strides = [1, 1]} : vector<2x384xf32> to vector<2x32xf32>
    %310 = vector.extract_strided_slice %308 {offsets = [0, 0], sizes = [2, 32], strides = [1, 1]} : vector<2x384xf32> to vector<2x32xf32>
    %311 = arith.addf %309, %310 : vector<2x32xf32>
    %cst_83 = arith.constant 0.000000e+00 : f32
    %312 = vector.broadcast %cst_83 : f32 to vector<2x32xf32>
    %313 = arith.subf %312, %311 : vector<2x32xf32>
    %314 = math.exp %313 : vector<2x32xf32>
    %cst_84 = arith.constant 1.000000e+00 : f32
    %315 = vector.broadcast %cst_84 : f32 to vector<2x32xf32>
    %316 = arith.addf %315, %314 : vector<2x32xf32>
    %cst_85 = arith.constant 1.000000e+00 : f32
    %317 = vector.broadcast %cst_85 : f32 to vector<2x32xf32>
    %318 = arith.divf %317, %316 : vector<2x32xf32>
    %319 = vector.extract_strided_slice %77 {offsets = [0, 128], sizes = [2, 32], strides = [1, 1]} : vector<2x384xf32> to vector<2x32xf32>
    %320 = vector.extract_strided_slice %308 {offsets = [0, 128], sizes = [2, 32], strides = [1, 1]} : vector<2x384xf32> to vector<2x32xf32>
    %321 = arith.addf %319, %320 : vector<2x32xf32>
    %cst_86 = arith.constant 0.000000e+00 : f32
    %322 = vector.broadcast %cst_86 : f32 to vector<2x32xf32>
    %323 = arith.subf %322, %321 : vector<2x32xf32>
    %324 = math.exp %323 : vector<2x32xf32>
    %cst_87 = arith.constant 1.000000e+00 : f32
    %325 = vector.broadcast %cst_87 : f32 to vector<2x32xf32>
    %326 = arith.addf %325, %324 : vector<2x32xf32>
    %cst_88 = arith.constant 1.000000e+00 : f32
    %327 = vector.broadcast %cst_88 : f32 to vector<2x32xf32>
    %328 = arith.divf %327, %326 : vector<2x32xf32>
    %329 = vector.extract_strided_slice %77 {offsets = [0, 256], sizes = [2, 32], strides = [1, 1]} : vector<2x384xf32> to vector<2x32xf32>
    %330 = vector.extract_strided_slice %308 {offsets = [0, 256], sizes = [2, 32], strides = [1, 1]} : vector<2x384xf32> to vector<2x32xf32>
    %331 = arith.mulf %318, %330 : vector<2x32xf32>
    %332 = arith.addf %329, %331 : vector<2x32xf32>
    %333 = math.tanh %332 : vector<2x32xf32>
    %cst_89 = arith.constant 1.000000e+00 : f32
    %334 = vector.broadcast %cst_89 : f32 to vector<2x32xf32>
    %335 = arith.subf %334, %328 : vector<2x32xf32>
    %336 = arith.mulf %335, %333 : vector<2x32xf32>
    %337 = arith.mulf %328, %306 : vector<2x32xf32>
    %338 = arith.addf %336, %337 : vector<2x32xf32>
    %c160 = arith.constant 160 : index
    %c0_90 = arith.constant 0 : index
    %339 = vector.load %arg1[%c160, %c0_90] : memref<200x384xf32, #tpu.memory_space<vmem>>, vector<32x384xf32>
    %340 = vector.extract_strided_slice %339 {offsets = [0, 0], sizes = [32, 128], strides = [1, 1]} : vector<32x384xf32> to vector<32x128xf32>
    %c192 = arith.constant 192 : index
    %c0_91 = arith.constant 0 : index
    %341 = vector.load %arg1[%c192, %c0_91] : memref<200x384xf32, #tpu.memory_space<vmem>>, vector<1x384xf32>
    %342 = vector.extract_strided_slice %341 {offsets = [0, 0], sizes = [1, 128], strides = [1, 1]} : vector<1x384xf32> to vector<1x128xf32>
    %cst_92 = arith.constant dense<0.000000e+00> : vector<2x128xf32>
    %343 = tpu.matmul %338, %340, %cst_92 {dimension_numbers = #tpu.dot_dimension_numbers<[1], [0], [0], [1], [0, 0, 1, 1], [], []>} : vector<2x32xf32>, vector<32x128xf32>, vector<2x128xf32> -> vector<2x128xf32>
    %344 = vector.broadcast %342 : vector<1x128xf32> to vector<2x128xf32>
    %345 = arith.addf %343, %344 : vector<2x128xf32>
    %c0_93 = arith.constant 0 : index
    %c0_94 = arith.constant 0 : index
    %346 = vector.load %arg2[%c0_93, %c0_94] : memref<2x128xf32, #tpu.memory_space<vmem>>, vector<2x128xf32>
    tpu.vector_store %arg2[%c0_93, %c0_94], %345 {strides = array<i32>} : memref<2x128xf32, #tpu.memory_space<vmem>>, vector<2x128xf32>,
    return
  }
}

</mosaic_0001>

<bundles_post_ra>
// kernel: forward.1
= control target key start
LH: loop header
LB: loop body
LE: loop exit
PB: predicated region body
PF: predicated region fallthrough
CT: control target
= control target key end

     0   :  { %7 = vsyncpa [#allocation3], 0  ;;  %s4382_s0 = inlined_call_operand.hbm [shape: f32[2,8,32], index: 0, kind: input, shape index: {}]   ;;  %s4383_s1 = inlined_call_operand.hbm [shape: f32[200,384], index: 1, kind: input, shape index: {}]   ;;  %s4384_s2 = inlined_call_operand.hbm [shape: f32[2,128], index: 2, kind: output, shape index: {}]  }
   0x1   :  { %8 = vsyncpa [#allocation6], 0 }
   0x2   :  { %9 = vsyncpa [#allocation4], 0  ;;  %s3944_s9 = smov [#allocation2]   ;;  %s3872_s13 = scalar_lea.hbm %s4382_s0, 256 }
   0x3   :  { %s15_s10 = sshll.u32 %s3944_s9, 4  ;;  %p3873_p0 = scmp.ne.s32.totalorder %s4382_s0, %s3872_s13  ;;  %s16_s10 = int_to_ptr.vmem [resolvable:$true] %s15_s10 }
   0x4   :  { %p3876_p1 = scmp.lt.u32.totalorder %s3872_s13, %s4382_s0 }
   0x6   :  { %p3878_p2 = pnand %p3876_p1, %p3873_p0 }
   0x8   :  { %3881 = shalt.err (!%p3878_p2)
}
   0x9   :  { %s3882_s18 = scalar_lea.vmem %s16_s10, 256  ;;  %p3887_p4 = scmp.lt.s32.totalorder %s16_s10, %s16_s10 }
   0xa   :  { %p3883_p3 = scmp.ne.s32.totalorder %s16_s10, %s3882_s18  ;;  %p3888_p5 = scmp.lt.s32.totalorder %s3882_s18, %s3882_s18 }
   0xc   :  { %p3889_p6 = por %p3888_p5, %p3887_p4 }
   0xe   :  { %p3890_p7 = pnand %p3889_p6, %p3883_p3 }
  0x10   :  { %3893 = shalt.err (!%p3890_p7)
}
  0x11   :  { %s3945_s19 = smov 128   ;;  %s3946_s20 = smov 8  }
  0x12   :  { %21 = dma.hbm_to_vmem [thread:$0]  %s4382_s0, 256, %s16_s10, [#allocation3], %s3945_s19, %s3945_s19, %s3946_s20  }
  0x13   :  { %s3947_s23 = smov [#allocation5]   ;;  %s3894_s27 = scalar_lea.hbm %s4383_s1, 9600 }
  0x14   :  { %s27_s24 = sshll.u32 %s3947_s23, 4  ;;  %p3895_p8 = scmp.ne.s32.totalorder %s4383_s1, %s3894_s27  ;;  %s28_s24 = int_to_ptr.vmem [resolvable:$true] %s27_s24 }
  0x15   :  { %p3898_p9 = scmp.lt.u32.totalorder %s3894_s27, %s4383_s1 }
  0x17   :  { %p3900_p10 = pnand %p3898_p9, %p3895_p8 }
  0x19   :  { %3903 = shalt.err (!%p3900_p10)
}
  0x1a   :  { %s3904_s4 = scalar_lea.vmem %s28_s24, 9600  ;;  %p3909_p12 = scmp.lt.s32.totalorder %s28_s24, %s28_s24 }
  0x1b   :  { %p3905_p11 = scmp.ne.s32.totalorder %s28_s24, %s3904_s4  ;;  %p3910_p13 = scmp.lt.s32.totalorder %s3904_s4, %s3904_s4 }
  0x1d   :  { %p3911_p0 = por %p3910_p13, %p3909_p12 }
  0x1f   :  { %p3912_p1 = pnand %p3911_p0, %p3905_p11 }
  0x21   :  { %3915 = shalt.err (!%p3912_p1)
}
  0x22   :  { %s3948_s0 = smov 384   ;;  %s3949_s5 = smov 24  }
  0x23   :  { %33 = dma.hbm_to_vmem [thread:$0]  %s4383_s1, 9600, %s28_s24, [#allocation6], %s3948_s0, %s3948_s0, %s3949_s5  }
  0x24   :  { %3938 = dma.done.wait [#allocation3], 256  }
  0x25   :  { %3939 = vsyncadd [#allocation3], 4294967040 }
  0x26   :  { %3940 = dma.done.wait [#allocation6], 9600  }
  0x27   :  { %3941 = vsyncadd [#allocation6], 4294957696  ;;  %v3950_v0 = vmov 0.0   ;;  %v61_v1 = vld [vmem:[#allocation5 + $0x8] sm:$0xff]  ;;  %v64_v2 = vld [vmem:[#allocation5 + $0x20] sm:$0xff]  ;;  %vm90_vm0 = vcmask 261120   ;;  %v45_v21 = vlaneseq }
  0x28   :  { %161 = vmatprep.mubr.f32.mxu0 %v3950_v0  ;;  %v60_v3 = vld [vmem:[#allocation5] sm:$0xff]  ;;  %v3508_v4 = vpack.c.bf16 %v64_v2, %v61_v1  ;;  %v63_v5 = vld [vmem:[#allocation5 + $0x18] sm:$0xff]  ;;  %v70_v7 = vld [vmem:[#allocation5 + $0x50] sm:$0xff]  ;;  %vm3951_vm1 = vmmov 0   ;;  %vm249_vm2 = vcmask 130048   ;;  %vm404_vm3 = vcmask 64512  }
  0x29   :  { %v67_v6 = vld [vmem:[#allocation5 + $0x38] sm:$0xff]  ;;  %v3510_v8 = vpack.c.bf16 %v63_v5, %v60_v3  ;;  %v66_v10 = vld [vmem:[#allocation5 + $0x30] sm:$0xff]  ;;  %v69_v11 = vld [vmem:[#allocation5 + $0x48] sm:$0xff]  ;;  %v46_v22 = vshrl.u32 %v45_v21, 7  ;;  %vm1648_vm4 = vcmask 1041409   ;;  %s3953_s1 = smov [#allocation7]  }
  0x2a   :  { %v3512_v9 = vpack.c.bf16 %v70_v7, %v67_v6  ;;  %v3994_v12 = vld [vmem:[#allocation2] sm:$0xff]  ;;  %3509 = vmatprep.subr.bf16.mxu0 %v3508_v4  ;;  %v65_v14 = vld [vmem:[#allocation5 + $0x28] sm:$0xff]  ;;  %v3514_v15 = vpack.c.bf16 %v69_v11, %v66_v10  ;;  %v68_v17 = vld [vmem:[#allocation5 + $0x40] sm:$0xff]  ;;  %s3199_s8 = sshll.u32 %s3953_s1, 4  ;;  %s3200_s8 = int_to_ptr.vmem [resolvable:$true] %s3199_s8 }
  0x2b   :  { %v62_v13 = vld [vmem:[#allocation5 + $0x10] sm:$0xff]  ;;  %3341 = vmatprep.mubr.msk.f32.mxu1 %vm90_vm0, %v3994_v12  ;;  %3511 = vmatpush1.bf16.msra.mxu0 %v3510_v8  ;;  %v71_v18 = vld [vmem:[#allocation5 + $0x58] sm:$0xff]  ;;  %v4013_v23 = vsub.s32 1, %v46_v22  ;;  %v4015_v25 = vsub.s32 2, %v46_v22  ;;  %v4017_v26 = vsub.s32 0, %v46_v22  ;;  %v576_v3 = vld [vmem:[#allocation5 + $0x108] sm:$0xff]  ;;  %p3921_p3 = scmp.lt.s32.totalorder %s3200_s8, %s3200_s8 }
  0x2c   :  { %v3516_v16 = vpack.c.bf16 %v65_v14, %v62_v13  ;;  %3513 = vmatprep.subr.bf16.mxu0 %v3512_v9  ;;  %v3520_v19 = vpack.c.bf16 %v71_v18, %v68_v17  ;;  %v4002_v20 = vld [vmem:[#allocation2 + $0x8] sm:$0xff]  ;;  %v73_v24 = vld [vmem:[#allocation5 + $0xc0] ss:$8 sm:$0x7]  ;;  %s3916_s9 = scalar_lea.vmem %s3200_s8, 32 }
  0x2d   :  { %v82_v27 = vrot.slane %v73_v24, %v4013_v23  ;;  %v86_v29 = vrot.slane %v73_v24, %v4015_v25  ;;  %v78_v30 = vrot.slane %v73_v24, %v4017_v26  ;;  %v574_v60 = vld [vmem:[#allocation5 + $0xf8] sm:$0xff]  ;;  %v577_v61 = vld [vmem:[#allocation5 + $0x110] sm:$0xff]  ;;  %v575_v9 = vld [vmem:[#allocation5 + $0x100] sm:$0xff]  ;;  %p3917_p2 = scmp.ne.s32.totalorder %s3200_s8, %s3916_s9  ;;  %p3922_p4 = scmp.lt.s32.totalorder %s3916_s9, %s3916_s9 }
  0x2e   :  { %3517 = vmatprep.subr.bf16.mxu1 %v3516_v16  ;;  %v3524_v62 = vpack.c.bf16 %v577_v61, %v574_v60  ;;  %v573_v2 = vld [vmem:[#allocation5 + $0xf0] sm:$0xff]  ;;  %v578_v10 = vld [vmem:[#allocation5 + $0x118] sm:$0xff]  ;;  %v744_v11 = vld [vmem:[#allocation5 + $0x68] sm:$0xff] }
  0x2f   :  { %3519 = vmatpush3.bf16.msra.mxu1 %v3516_v16  ;;  %3515 = vmatpush1.bf16.msra.mxu0 %v3514_v15  ;;  %v3526_v5 = vpack.c.bf16 %v576_v3, %v573_v2  ;;  %v3528_v13 = vpack.c.bf16 %v578_v10, %v575_v9  ;;  %v747_v14 = vld [vmem:[#allocation5 + $0x80] sm:$0xff]  ;;  %v745_v16 = vld [vmem:[#allocation5 + $0x70] sm:$0xff]  ;;  %v748_v17 = vld [vmem:[#allocation5 + $0x88] sm:$0xff]  ;;  %p3923_p5 = por %p3922_p4, %p3921_p3 }
  0x30   :  { %3521 = vmatprep.subr.bf16.mxu1 %v3520_v19  ;;  %3359 = vmatprep.subr.mxu0 %v3950_v0  ;;  %v3532_v15 = vpack.c.bf16 %v747_v14, %v744_v11  ;;  %v3540_v18 = vpack.c.bf16 %v748_v17, %v745_v16  ;;  %v746_v21 = vld [vmem:[#allocation5 + $0x78] sm:$0xff]  ;;  %v753_v24 = vld [vmem:[#allocation5 + $0xb0] sm:$0xff]  ;;  %v1251_v9 = vld [vmem:[#allocation5 + $0x140] sm:$0xff] }
  0x31   :  { %v750_v22 = vld [vmem:[#allocation5 + $0x98] sm:$0xff]  ;;  %v1247_v16 = vld [vmem:[#allocation5 + $0x120] sm:$0xff]  ;;  %p3924_p6 = pnand %p3923_p5, %p3917_p2 }
  0x32   :  { %3209 = vmatmul.mubr.msk.f32.vlgmr.msra.gmra.mrb[0].mxu0 %vm90_vm0, %v3994_v12  ;;  %v1250_v17 = vld [vmem:[#allocation5 + $0x138] sm:$0xff] }
  0x33   :  { %3523 = vmatpush3.bf16.msra.mxu1 %v3520_v19  ;;  %167 = vmatprep.mubr.f32.mxu0 %v3950_v0  ;;  %v743_v19 = vld [vmem:[#allocation5 + $0x60] sm:$0xff] }
  0x34   :  { %3344 = vmatprep.subr.mxu1 %v3950_v0 }
  0x36   :  { %3342 = vmatmul.mubr.msk.f32.vlgmr.msra.gmra.mrb[0].mxu1 %vm90_vm0, %v4002_v20  ;;  %3210 = vmatmul.mubr.msk.f32.gmra.mrb[2].mxu0 %vm90_vm0, %v4002_v20 }
  0x37   :  { %3346 = vmatprep.mubr.msk.f32.mxu1 %vm3951_vm1, %v3950_v0  ;;  %3361 = vmatprep.mubr.msk.f32.mxu0 %vm3951_vm1, %v3950_v0 }
 0x105   :  { %v163_v28 = vpop.f32.mrb[0].mxu0 }
 0x106   :  { %v165_v31 = vpop.f32.mrb[1].mxu0  ;;  %v164_v37 = vadd.f32 %v163_v28, %v78_v30  ;;  %v3536_v28 = vpack.c.bf16 %v753_v24, %v750_v22  ;;  %v1249_v22 = vld [vmem:[#allocation5 + $0x130] sm:$0xff]  ;;  %v1252_v24 = vld [vmem:[#allocation5 + $0x148] sm:$0xff] }
 0x107   :  { %v166_v32 = vadd.f32 %v165_v31, %v82_v27 }
 0x109   :  { %v3343_v33 = vpop.f32.mrb[0].mxu1  ;;  %v169_v34 = vpop.f32.mrb[2].mxu0  ;;  %3345 = vmatpush3.xpose.msk.msra.mxu1 %vm249_vm2, %v166_v32 }
 0x10a   :  { %v246_v35 = vadd.f32 %v3343_v33, %v86_v29  ;;  %v240_v36 = vpop.f32.mrb[1].mxu1  ;;  %v171_v38 = vpop.f32.mrb[3].mxu0  ;;  %3349 = vmatprep.subr.mxu1 %v3950_v0  ;;  %v170_v41 = vadd.f32 %v169_v34, %v78_v30  ;;  %v752_v30 = vld [vmem:[#allocation5 + $0xa8] sm:$0xff]  ;;  %v751_v33 = vld [vmem:[#allocation5 + $0xa0] sm:$0xff]  ;;  %v754_v34 = vld [vmem:[#allocation5 + $0xb8] sm:$0xff] }
 0x10b   :  { %v172_v39 = vadd.f32 %v171_v38, %v82_v27  ;;  %v241_v40 = vadd.f32 %v240_v36, %v86_v29  ;;  %v3534_v27 = vpack.c.bf16 %v746_v21, %v743_v19  ;;  %v749_v29 = vld [vmem:[#allocation5 + $0x90] sm:$0xff]  ;;  %v3550_v19 = vpack.c.bf16 %v1250_v17, %v1247_v16 }
 0x10c   :  { %3360 = vmatpush3.msra.mxu0 %v246_v35  ;;  %3347 = vmatmul.mubr.msk.f32.vlgmr.msra.gmra.mrb[2].mxu1 %vm249_vm2, %v164_v37  ;;  %v3538_v35 = vpack.c.bf16 %v752_v30, %v749_v29  ;;  %v3544_v37 = vpack.c.bf16 %v754_v34, %v751_v33  ;;  %v1421_v29 = vld [vmem:[#allocation5 + $0x188] sm:$0xff]  ;;  %v1422_v33 = vld [vmem:[#allocation5 + $0x190] sm:$0xff] }
 0x10d   :  { %3350 = vmatpush3.xpose.msk.msra.mxu1 %vm249_vm2, %v172_v39  ;;  %3351 = vmatprep.mubr.msk.f32.mxu1 %vm3951_vm1, %v3950_v0  ;;  %v756_v39 = vld [vmem:[#allocation5 + $0xd8] ss:$8 sm:$0x7] }
 0x10e   :  { %3354 = vmatprep.subr.mxu1 %v3950_v0  ;;  %3529 = vmatprep.subr.bf16.mxu0 %v3528_v13 }
 0x110   :  { %3352 = vmatmul.mubr.msk.f32.vlgmr.msra.gmra.mrb[4].mxu1 %vm249_vm2, %v170_v41  ;;  %v761_v41 = vrot.slane %v756_v39, %v4017_v26 }
 0x111   :  { %3355 = vmatpush3.msra.mxu1 %v241_v40  ;;  %3356 = vmatprep.mubr.msk.f32.mxu1 %vm3951_vm1, %v3950_v0 }
 0x112   :  { %3525 = vmatprep.subr.bf16.mxu1 %v3524_v62 }
 0x1df   :  { %v322_v42 = vpop.f32.mrb[2].mxu1 }
 0x1e0   :  { %v402_v43 = vmul.f32 0.25, %v322_v42  ;;  %v3348_v44 = vpop.f32.mrb[3].mxu1 }
 0x1e1   :  { %v769_v44 = vrot.slane %v756_v39, %v4015_v25 }
 0x1e2   :  { %v405_v45 = vsel %vm404_vm3, %v402_v43, -inf }
 0x1e3   :  { %406 = vmax.xlane.f32.xlu0 %v405_v45  ;;  %v398_v46 = vpop.f32.mrb[4].mxu1 }
 0x1e4   :  { %v403_v47 = vmul.f32 0.25, %v398_v46  ;;  %v3353_v48 = vpop.f32.mrb[5].mxu1 }
 0x1e6   :  { %v408_v49 = vsel %vm404_vm3, %v403_v47, -inf }
 0x1e7   :  { %409 = vmax.xlane.f32.xlu0 %v408_v49 }
 0x270   :  { %v407_v50 = vpop.xlane.xlu0 %406 }
 0x271   :  { %v411_v51 = vsub.f32 %v402_v43, %v407_v50 }
 0x273   :  { %v413_v52 = vmul.f32 1.442695, %v411_v51 }
 0x274   :  { %v410_v53 = vpop.xlane.xlu0 %409 }
 0x275   :  { %3696 = vpow2.f32 %v413_v52  ;;  %v412_v54 = vsub.f32 %v403_v47, %v410_v53 }
 0x277   :  { %v415_v55 = vmul.f32 1.442695, %v412_v54 }
 0x279   :  { %3698 = vpow2.f32 %v415_v55 }
 0x27f   :  { %v3697_v56 = vpop.eup %3696 }
 0x280   :  { %v417_v57 = vsel %vm404_vm3, %v3697_v56, 0.0 }
 0x281   :  { %418 = vadd.xlane.f32.xlu1 %v417_v57 }
 0x283   :  { %v3699_v58 = vpop.eup %3698 }
 0x284   :  { %v420_v59 = vsel %vm404_vm3, %v3699_v58, 0.0 }
 0x285   :  { %421 = vadd.xlane.f32.xlu1 %v420_v59 }
 0x30e   :  { %v419_v63 = vpop.xlane.xlu1 %418 }
 0x30f   :  { %3700 = vrcp.f32 %v419_v63 }
 0x312   :  { %v422_v1 = vpop.xlane.xlu1 %421 }
 0x313   :  { %3702 = vrcp.f32 %v422_v1 }
 0x319   :  { %v3701_v4 = vpop.eup %3700 }
 0x31a   :  { %v424_v6 = vmul.f32 %v3701_v4, %v3697_v56 }
 0x31c   :  { %3357 = vmatmul.mubr.msk.f32.vlgmr.msra.gmra.mrb[6].mxu1 %vm404_vm3, %v424_v6 }
 0x31d   :  { %v3703_v7 = vpop.eup %3702  ;;  %3527 = vmatpush1.bf16.msra.mxu1 %v3526_v5  ;;  %649 = vmatprep.mubr.f32.mxu1 %v3950_v0 }
 0x31e   :  { %v426_v8 = vmul.f32 %v3703_v7, %v3699_v58  ;;  %3533 = vmatprep.subr.bf16.mxu1 %v3532_v15 }
 0x320   :  { %3362 = vmatmul.mubr.msk.f32.vlgmr.msra.gmra.mrb[4].mxu0 %vm404_vm3, %v426_v8  ;;  %v1248_v8 = vld [vmem:[#allocation5 + $0x128] sm:$0xff] }
 0x321   :  { %3531 = vmatpush3.bf16.msra.mxu0 %v3528_v13  ;;  %v3548_v10 = vpack.c.bf16 %v1251_v9, %v1248_v8 }
 0x322   :  { %3541 = vmatprep.subr.bf16.mxu0 %v3540_v18 }
 0x3ef   :  { %v496_v31 = vpop.f32.mrb[6].mxu1 }
 0x3f0   :  { %v3358_v32 = vpop.f32.mrb[7].mxu1  ;;  %3219 = vmatmul.mubr.msk.f32.vlgmr.msra.gmra.mrb[8].mxu1 %vm249_vm2, %v496_v31  ;;  %3368 = vmatprep.mubr.msk.f32.mxu0 %vm249_vm2, %v496_v31  ;;  %v3952_v31 = vmov 0.0|0.0  }
 0x3f1   :  { %3535 = vmatpush1.bf16.msra.mxu1 %v3534_v27  ;;  %655 = vmatprep.mubr.f32.mxu1 %v3950_v0  ;;  %v3552_v27 = vpack.c.bf16 %v1252_v24, %v1249_v22  ;;  %v1419_v32 = vld [vmem:[#allocation5 + $0x178] sm:$0xff] }
 0x3f2   :  { %3537 = vmatprep.subr.bf16.mxu1 %v3536_v28  ;;  %v1418_v28 = vld [vmem:[#allocation5 + $0x170] sm:$0xff]  ;;  %v4084_v34 = vpack.c.bf16 %v1422_v33, %v1419_v32 }
 0x3f3   :  { %v569_v36 = vpop.f32.mrb[4].mxu0  ;;  %v4080_v30 = vpack.c.bf16 %v1421_v29, %v1418_v28 }
 0x3f4   :  { %v3363_v38 = vpop.f32.mrb[5].mxu0  ;;  %3220 = vmatmul.mubr.msk.f32.gmra.mrb[10].mxu1 %vm249_vm2, %v569_v36  ;;  %3369 = vmatmul.mubr.msk.f32.vlgmr.msra.gmra.mrb[6].mxu0 %vm249_vm2, %v569_v36  ;;  %v1420_v36 = vld [vmem:[#allocation5 + $0x180] sm:$0xff] }
 0x3f5   :  { %3539 = vmatpush1.bf16.msra.mxu1 %v3538_v35  ;;  %837 = vmatprep.mubr.f32.mxu1 %v3950_v0  ;;  %v1417_v35 = vld [vmem:[#allocation5 + $0x168] sm:$0xff] }
 0x3f6   :  { %3543 = vmatpush3.bf16.msra.mxu0 %v3540_v18  ;;  %3379 = vmatprep.mubr.msk.f32.mxu0 %vm90_vm0, %v3994_v12 }
 0x3f7   :  { %3545 = vmatprep.subr.bf16.mxu0 %v3544_v37  ;;  %3387 = vmatprep.subr.mxu1 %v3950_v0 }
 0x3f8   :  { %3223 = vmatmul.mubr.msk.f32.vlgmr.msra.gmra.mrb[12].mxu1 %vm90_vm0, %v3994_v12  ;;  %v765_v12 = vrot.slane %v756_v39, %v4013_v23  ;;  %v1427_v39 = vld [vmem:[#allocation5 + $0x1b8] sm:$0xff] }
 0x3f9   :  { %843 = vmatprep.mubr.f32.mxu1 %v3950_v0 }
 0x3fa   :  { %3547 = vmatpush3.bf16.msra.mxu0 %v3544_v37  ;;  %v1424_v37 = vld [vmem:[#allocation5 + $0x1a0] sm:$0xff] }
 0x3fb   :  { %3382 = vmatprep.subr.mxu0 %v3950_v0 }
 0x3fc   :  { %3224 = vmatmul.mubr.msk.f32.gmra.mrb[14].mxu1 %vm90_vm0, %v4002_v20 }
 0x3fd   :  { %3380 = vmatmul.mubr.msk.f32.vlgmr.msra.gmra.mrb[8].mxu0 %vm90_vm0, %v4002_v20  ;;  %3389 = vmatprep.mubr.msk.f32.mxu1 %vm3951_vm1, %v3950_v0 }
 0x3fe   :  { %3384 = vmatprep.mubr.msk.f32.mxu0 %vm3951_vm1, %v3950_v0 }
 0x4cb   :  { %v839_v40 = vpop.f32.mrb[12].mxu1 }
 0x4cc   :  { %v841_v42 = vpop.f32.mrb[13].mxu1  ;;  %v840_v20 = vadd.f32 %v839_v40, %v761_v41  ;;  %v1428_v40 = vld [vmem:[#allocation5 + $0x1c0] sm:$0xff] }
 0x4cd   :  { %v842_v43 = vadd.f32 %v841_v42, %v765_v12  ;;  %v4089_v42 = vpack.c.bf16 %v1420_v36, %v1417_v35 }
 0x4cf   :  { %v845_v45 = vpop.f32.mrb[14].mxu1  ;;  %3383 = vmatpush3.xpose.msk.msra.mxu0 %vm249_vm2, %v842_v43  ;;  %v4092_v43 = vpack.c.bf16 %v1427_v39, %v1424_v37 }
 0x4d0   :  { %v847_v46 = vpop.f32.mrb[15].mxu1  ;;  %v3381_v47 = vpop.f32.mrb[8].mxu0  ;;  %3392 = vmatprep.subr.mxu0 %v3950_v0  ;;  %v846_v52 = vadd.f32 %v845_v45, %v761_v41  ;;  %v1426_v45 = vld [vmem:[#allocation5 + $0x1b0] sm:$0xff] }
 0x4d1   :  { %v848_v48 = vadd.f32 %v847_v46, %v765_v12  ;;  %v916_v49 = vpop.f32.mrb[9].mxu0  ;;  %v922_v51 = vadd.f32 %v3381_v47, %v769_v44  ;;  %v1425_v12 = vld [vmem:[#allocation5 + $0x1a8] sm:$0xff] }
 0x4d2   :  { %3385 = vmatmul.mubr.msk.f32.vlgmr.msra.gmra.mrb[10].mxu0 %vm249_vm2, %v840_v20  ;;  %v917_v50 = vadd.f32 %v916_v49, %v769_v44  ;;  %v1423_v44 = vld [vmem:[#allocation5 + $0x198] sm:$0xff]  ;;  %v4095_v20 = vpack.c.bf16 %v1428_v40, %v1425_v12 }
 0x4d3   :  { %3388 = vmatpush3.xpose.msk.msra.mxu1 %vm249_vm2, %v848_v48  ;;  %3394 = vmatprep.mubr.msk.f32.mxu0 %vm3951_vm1, %v3950_v0  ;;  %v4100_v48 = vpack.c.bf16 %v1426_v45, %v1423_v44 }
 0x4d4   :  { %3397 = vmatprep.subr.mxu1 %v3950_v0  ;;  %3393 = vmatpush3.msra.mxu0 %v917_v50 }
 0x4d5   :  { %3553 = vmatprep.subr.bf16.mxu0 %v3552_v27 }
 0x4d6   :  { %3390 = vmatmul.mubr.msk.f32.vlgmr.msra.gmra.mrb[16].mxu1 %vm249_vm2, %v846_v52 }
 0x4d7   :  { %3398 = vmatpush3.msra.mxu1 %v922_v51  ;;  %3399 = vmatprep.mubr.msk.f32.mxu1 %vm3951_vm1, %v3950_v0 }
 0x4d8   :  { %3549 = vmatprep.subr.bf16.mxu1 %v3548_v10 }
 0x5a5   :  { %v997_v53 = vpop.f32.mrb[10].mxu0 }
 0x5a6   :  { %v1077_v54 = vmul.f32 0.25, %v997_v53  ;;  %v3386_v55 = vpop.f32.mrb[11].mxu0 }
 0x5a7   :  { %v1430_v55 = vld [vmem:[#allocation5 + $0x1c8] ss:$8 sm:$0x7] }
 0x5a8   :  { %v1079_v56 = vsel %vm404_vm3, %v1077_v54, -inf  ;;  %v4146_v32 = vrot.slane %v1430_v55, %v4015_v25 }
 0x5a9   :  { %v1073_v57 = vpop.f32.mrb[16].mxu1  ;;  %1080 = vmax.xlane.f32.xlu0 %v1079_v56  ;;  %v43_v56 = vld [vmem:[#allocation5 + $0x150] ss:$8 sm:$0x7] }
 0x5aa   :  { %v1078_v58 = vmul.f32 0.25, %v1073_v57  ;;  %v3391_v59 = vpop.f32.mrb[17].mxu1  ;;  %v4124_v57 = vrot.slane %v1430_v55, %v4017_v26  ;;  %v56_v37 = vrot.slane %v43_v56, %v4015_v25 }
 0x5ac   :  { %v1082_v60 = vsel %vm404_vm3, %v1078_v58, -inf }
 0x5ad   :  { %1083 = vmax.xlane.f32.xlu1 %v1082_v60  ;;  %v4128_v60 = vrot.slane %v1430_v55, %v4013_v23 }
 0x636   :  { %v1081_v61 = vpop.xlane.xlu0 %1080 }
 0x637   :  { %v1085_v62 = vsub.f32 %v1077_v54, %v1081_v61  ;;  %v52_v61 = vrot.slane %v43_v56, %v4013_v23 }
 0x639   :  { %v1087_v63 = vmul.f32 1.442695, %v1085_v62 }
 0x63a   :  { %v1084_v1 = vpop.xlane.xlu1 %1083 }
 0x63b   :  { %3704 = vpow2.f32 %v1087_v63  ;;  %v1086_v2 = vsub.f32 %v1078_v58, %v1084_v1  ;;  %v48_v58 = vrot.slane %v43_v56, %v4017_v26 }
 0x63d   :  { %v1089_v3 = vmul.f32 1.442695, %v1086_v2 }
 0x63f   :  { %3706 = vpow2.f32 %v1089_v3 }
 0x645   :  { %v3705_v4 = vpop.eup %3704 }
 0x646   :  { %v1091_v5 = vsel %vm404_vm3, %v3705_v4, 0.0 }
 0x647   :  { %1092 = vadd.xlane.f32.xlu0 %v1091_v5 }
 0x649   :  { %v3707_v6 = vpop.eup %3706 }
 0x64a   :  { %v1094_v7 = vsel %vm404_vm3, %v3707_v6, 0.0 }
 0x64b   :  { %1095 = vadd.xlane.f32.xlu1 %v1094_v7 }
 0x6d4   :  { %v1093_v11 = vpop.xlane.xlu0 %1092 }
 0x6d5   :  { %3708 = vrcp.f32 %v1093_v11 }
 0x6d8   :  { %v1096_v13 = vpop.xlane.xlu1 %1095 }
 0x6d9   :  { %3710 = vrcp.f32 %v1096_v13 }
 0x6df   :  { %v3709_v14 = vpop.eup %3708 }
 0x6e0   :  { %v1098_v15 = vmul.f32 %v3709_v14, %v3705_v4 }
 0x6e2   :  { %3395 = vmatmul.mubr.msk.f32.vlgmr.msra.gmra.mrb[12].mxu0 %vm404_vm3, %v1098_v15 }
 0x6e3   :  { %v3711_v18 = vpop.eup %3710  ;;  %3555 = vmatpush3.bf16.msra.mxu0 %v3552_v27 }
 0x6e4   :  { %v1100_v21 = vmul.f32 %v3711_v18, %v3707_v6  ;;  %3557 = vmatprep.subr.bf16.mxu0 %v4080_v30 }
 0x6e6   :  { %3400 = vmatmul.mubr.msk.f32.vlgmr.msra.gmra.mrb[18].mxu1 %vm404_vm3, %v1100_v21 }
 0x6e7   :  { %3551 = vmatpush1.bf16.msra.mxu1 %v3550_v19  ;;  %1323 = vmatprep.mubr.f32.mxu1 %v3950_v0 }
 0x6e8   :  { %3564 = vmatprep.subr.bf16.mxu1 %v3952_v31 }
 0x7b5   :  { %v1170_v38 = vpop.f32.mrb[12].mxu0 }
 0x7b6   :  { %v3396_v41 = vpop.f32.mrb[13].mxu0  ;;  %3233 = vmatmul.mubr.msk.f32.vlgmr.msra.gmra.mrb[8].mxu1 %vm249_vm2, %v1170_v38  ;;  %3406 = vmatprep.mubr.msk.f32.mxu0 %vm249_vm2, %v1170_v38 }
 0x7b7   :  { %1329 = vmatprep.mubr.f32.mxu1 %v3950_v0  ;;  %3566 = vmatpush3.bf16.msra.mxu1 %v4084_v34 }
 0x7b8   :  { %3567 = vmatprep.subr.bf16.mxu1 %v3952_v31 }
 0x7b9   :  { %v1243_v46 = vpop.f32.mrb[18].mxu1 }
 0x7ba   :  { %v3401_v47 = vpop.f32.mrb[19].mxu1  ;;  %3234 = vmatmul.mubr.msk.f32.gmra.mrb[10].mxu1 %vm249_vm2, %v1243_v46  ;;  %3407 = vmatmul.mubr.msk.f32.vlgmr.msra.gmra.mrb[6].mxu0 %vm249_vm2, %v1243_v46 }
 0x7bb   :  { %3559 = vmatpush1.bf16.msra.mxu0 %v4089_v42  ;;  %1514 = vmatprep.mubr.f32.mxu0 %v3950_v0 }
 0x7bc   :  { %3561 = vmatprep.subr.bf16.mxu0 %v4092_v43  ;;  %3569 = vmatpush3.bf16.msra.mxu1 %v4095_v20 }
 0x7bd   :  { %3417 = vmatprep.mubr.msk.f32.mxu1 %vm3951_vm1, %v3950_v0  ;;  %3578 = vmatprep.subr.bf16.mxu1 %v3952_v31 }
 0x7bf   :  { %3563 = vmatpush1.bf16.msra.mxu0 %v4100_v48  ;;  %3418 = vmatmul.mubr.f32.vlgmr.msra.gmra.mrb[20].mxu1 %v3950_v0 }
 0x7c0   :  { %3571 = vmatprep.subr.bf16.mxu0 %v4080_v30  ;;  %3580 = vmatpush3.bf16.msra.mxu1 %v4084_v34 }
 0x7c1   :  { %3581 = vmatprep.subr.bf16.mxu1 %v3952_v31  ;;  %3428 = vmatprep.mubr.msk.f32.mxu1 %vm3951_vm1, %v3950_v0 }
 0x7c2   :  { %1515 = vmatmul.mubr.f32.vlgmr.msra.gmra.mrb[14].mxu0 %v3950_v0 }
 0x7c3   :  { %3573 = vmatpush1.bf16.msra.mxu0 %v4089_v42  ;;  %1716 = vmatprep.mubr.f32.mxu0 %v3950_v0 }
 0x7c4   :  { %3575 = vmatprep.subr.bf16.mxu0 %v4092_v43  ;;  %3583 = vmatpush3.bf16.msra.mxu1 %v4095_v20 }
 0x7c5   :  { %3592 = vmatprep.subr.bf16.mxu1 %v3952_v31 }
 0x7c7   :  { %3577 = vmatpush1.bf16.msra.mxu0 %v4100_v48 }
 0x7c8   :  { %3585 = vmatprep.subr.bf16.mxu0 %v4080_v30 }
 0x889   :  { %v1325_v49 = vpop.f32.mrb[8].mxu1 }
 0x88a   :  { %v1327_v50 = vpop.f32.mrb[9].mxu1  ;;  %v4131_v1 = vadd.f32 %v1325_v49, %v48_v58 }
 0x88b   :  { %v4134_v4 = vadd.f32 %v1327_v50, %v52_v61 }
 0x88d   :  { %v1331_v51 = vpop.f32.mrb[10].mxu1  ;;  %v3408_v52 = vpop.f32.mrb[6].mxu0 }
 0x88e   :  { %v1333_v53 = vpop.f32.mrb[11].mxu1  ;;  %v1402_v54 = vpop.f32.mrb[7].mxu0  ;;  %v4137_v6 = vadd.f32 %v1331_v51, %v48_v58  ;;  %v4152_v46 = vadd.f32 %v3408_v52, %v56_v37 }
 0x88f   :  { %v4140_v9 = vadd.f32 %v1333_v53, %v52_v61  ;;  %v4150_v41 = vadd.f32 %v1402_v54, %v56_v37 }
 0x892   :  { %v1587_v59 = vpop.f32.mrb[20].mxu1 }
 0x893   :  { %v3419_v62 = vpop.f32.mrb[21].mxu1  ;;  %v1588_v35 = vadd.f32 %v1587_v59, %v4146_v32 }
 0x895   :  { %v1516_v63 = vpop.f32.mrb[14].mxu0  ;;  %v1628_v12 = vrot.slane %v1588_v35, 1 }
 0x896   :  { %v1517_v2 = vadd.f32 %v1516_v63, %v4124_v57  ;;  %v1518_v3 = vpop.f32.mrb[15].mxu0 }
 0x897   :  { %v1519_v5 = vadd.f32 %v1518_v3, %v4128_v60 }
 0x898   :  { %v1592_v7 = vrot.slane %v1517_v2, 1  ;;  %v1595_v8 = vadd.f32 %v4131_v1, %v1517_v2 }
 0x899   :  { %v1610_v10 = vrot.slane %v1519_v5, 1  ;;  %v1613_v23 = vadd.f32 %v4134_v4, %v1519_v5 }
 0x89a   :  { %v1596_v11 = vadd.f32 %v4137_v6, %v1592_v7  ;;  %v1597_v13 = vsub.f32 0.0, %v1595_v8 }
 0x89b   :  { %v1614_v14 = vadd.f32 %v4140_v9, %v1610_v10  ;;  %v1615_v17 = vsub.f32 0.0, %v1613_v23 }
 0x89c   :  { %v1598_v15 = vsub.f32 0.0, %v1596_v11  ;;  %v1599_v16 = vmul.f32 1.442695, %v1597_v13 }
 0x89d   :  { %v1616_v19 = vsub.f32 0.0, %v1614_v14  ;;  %v1617_v21 = vmul.f32 1.442695, %v1615_v17 }
 0x89e   :  { %3712 = vpow2.f32 %v1599_v16  ;;  %v1601_v18 = vmul.f32 1.442695, %v1598_v15 }
 0x89f   :  { %v1619_v22 = vmul.f32 1.442695, %v1616_v19 }
 0x8a0   :  { %3714 = vpow2.f32 %v1601_v18 }
 0x8a1   :  { %3716 = vpow2.f32 %v1617_v21 }
 0x8a2   :  { %3718 = vpow2.f32 %v1619_v22 }
 0x8a8   :  { %v3713_v24 = vpop.eup %3712 }
 0x8a9   :  { %v1603_v27 = vadd.f32 1.0, %v3713_v24 }
 0x8aa   :  { %v3715_v28 = vpop.eup %3714 }
 0x8ab   :  { %v1604_v29 = vadd.f32 1.0, %v3715_v28  ;;  %3720 = vrcp.f32 %v1603_v27  ;;  %v3717_v33 = vpop.eup %3716 }
 0x8ac   :  { %v3719_v36 = vpop.eup %3718  ;;  %v1621_v38 = vadd.f32 1.0, %v3717_v33 }
 0x8ad   :  { %3722 = vrcp.f32 %v1604_v29  ;;  %v1622_v39 = vadd.f32 1.0, %v3719_v36 }
 0x8ae   :  { %3724 = vrcp.f32 %v1621_v38 }
 0x8af   :  { %3726 = vrcp.f32 %v1622_v39 }
 0x8b5   :  { %v3721_v40 = vpop.eup %3720 }
 0x8b6   :  { %v1631_v44 = vmul.f32 %v3721_v40, %v1588_v35 }
 0x8b7   :  { %v3723_v45 = vpop.eup %3722 }
 0x8b8   :  { %v1632_v47 = vmul.f32 %v3723_v45, %v1628_v12  ;;  %v1633_v49 = vadd.f32 %v4150_v41, %v1631_v44  ;;  %v3725_v25 = vpop.eup %3724 }
 0x8b9   :  { %v3727_v51 = vpop.eup %3726  ;;  %v1637_v53 = vsub.f32 1.0, %v3725_v25  ;;  %v1641_v58 = vmul.f32 0.0, %v3725_v25 }
 0x8ba   :  { %v1634_v50 = vadd.f32 %v4152_v46, %v1632_v47  ;;  %3728 = vtanh.f32 %v1633_v49  ;;  %v1638_v56 = vsub.f32 1.0, %v3727_v51  ;;  %v1642_v62 = vmul.f32 0.0, %v3727_v51 }
 0x8bc   :  { %3730 = vtanh.f32 %v1634_v50 }
 0x8c4   :  { %v3729_v55 = vpop.eup %3728 }
 0x8c5   :  { %v1639_v54 = vmul.f32 %v3729_v55, %v1637_v53 }
 0x8c6   :  { %v3731_v59 = vpop.eup %3730 }
 0x8c7   :  { %v1640_v61 = vmul.f32 %v3731_v59, %v1638_v56  ;;  %v4156_v52 = vadd.f32 %v1641_v58, %v1639_v54 }
 0x8c9   :  { %v4158_v63 = vadd.f32 %v1642_v62, %v1640_v61  ;;  %v1843_v51 = vrot.slane %v4156_v52, 7 }
 0x8cb   :  { %v1647_v2 = vrot.slane %v4158_v63, 7 }
 0x8cd   :  { %v1649_v3 = vsel %vm1648_vm4, %v1647_v2, %v4156_v52 }
 0x8ce   :  { %3237 = vmatmul.mubr.msk.f32.vlgmr.msra.gmra.mrb[16].mxu0 %vm90_vm0, %v1649_v3  ;;  %3429 = vmatmul.mubr.msk.f32.vlgmr.msra.gmra.mrb[22].mxu1 %vm90_vm0, %v1649_v3 }
 0x8cf   :  { %3587 = vmatpush1.bf16.msra.mxu0 %v4089_v42  ;;  %3594 = vmatpush3.bf16.msra.mxu1 %v4084_v34 }
 0x8d0   :  { %3589 = vmatprep.subr.bf16.mxu0 %v4092_v43  ;;  %3595 = vmatprep.subr.bf16.mxu1 %v3952_v31 }
 0x8d1   :  { %1920 = vmatprep.mubr.f32.mxu0 %v3950_v0  ;;  %3439 = vmatprep.mubr.msk.f32.mxu1 %vm3951_vm1, %v3950_v0 }
 0x8d3   :  { %3591 = vmatpush1.bf16.msra.mxu0 %v4100_v48  ;;  %3597 = vmatpush3.bf16.msra.mxu1 %v4095_v20 }
 0x8d4   :  { %3599 = vmatprep.subr.bf16.mxu0 %v4080_v30  ;;  %3606 = vmatprep.subr.bf16.mxu1 %v3952_v31 }
 0x9a1   :  { %v1718_v5 = vpop.f32.mrb[16].mxu0  ;;  %v1789_v7 = vpop.f32.mrb[22].mxu1 }
 0x9a2   :  { %v1719_v8 = vadd.f32 %v1718_v5, %v4124_v57  ;;  %v1720_v10 = vpop.f32.mrb[17].mxu0  ;;  %v3430_v23 = vpop.f32.mrb[23].mxu1  ;;  %v1790_v44 = vadd.f32 %v1789_v7, %v4146_v32 }
 0x9a3   :  { %v1721_v11 = vadd.f32 %v1720_v10, %v4128_v60 }
 0x9a4   :  { %v1794_v13 = vrot.slane %v1719_v8, 7  ;;  %v1798_v14 = vadd.f32 %v4137_v6, %v1719_v8  ;;  %v1830_v49 = vrot.slane %v1790_v44, 7 }
 0x9a5   :  { %v1812_v15 = vrot.slane %v1721_v11, 7  ;;  %v1816_v16 = vadd.f32 %v4140_v9, %v1721_v11 }
 0x9a6   :  { %v1797_v17 = vadd.f32 %v4131_v1, %v1794_v13  ;;  %v1800_v18 = vsub.f32 0.0, %v1798_v14 }
 0x9a7   :  { %v1815_v19 = vadd.f32 %v4134_v4, %v1812_v15  ;;  %v1818_v27 = vsub.f32 0.0, %v1816_v16 }
 0x9a8   :  { %v1799_v21 = vsub.f32 0.0, %v1797_v17  ;;  %v1803_v22 = vmul.f32 1.442695, %v1800_v18 }
 0x9a9   :  { %v1817_v24 = vsub.f32 0.0, %v1815_v19  ;;  %v1821_v33 = vmul.f32 1.442695, %v1818_v27 }
 0x9aa   :  { %v1801_v28 = vmul.f32 1.442695, %v1799_v21  ;;  %3732 = vpow2.f32 %v1803_v22 }
 0x9ab   :  { %v1819_v29 = vmul.f32 1.442695, %v1817_v24 }
 0x9ac   :  { %3734 = vpow2.f32 %v1801_v28 }
 0x9ad   :  { %3736 = vpow2.f32 %v1819_v29 }
 0x9ae   :  { %3738 = vpow2.f32 %v1821_v33 }
 0x9b4   :  { %v3733_v35 = vpop.eup %3732 }
 0x9b5   :  { %v1806_v36 = vadd.f32 1.0, %v3733_v35 }
 0x9b6   :  { %v3735_v37 = vpop.eup %3734 }
 0x9b7   :  { %v3737_v38 = vpop.eup %3736  ;;  %v1805_v39 = vadd.f32 1.0, %v3735_v37  ;;  %3740 = vrcp.f32 %v1806_v36 }
 0x9b8   :  { %v1823_v12 = vadd.f32 1.0, %v3737_v38  ;;  %v3739_v40 = vpop.eup %3738 }
 0x9b9   :  { %3742 = vrcp.f32 %v1805_v39  ;;  %v1824_v45 = vadd.f32 1.0, %v3739_v40 }
 0x9ba   :  { %3744 = vrcp.f32 %v1823_v12 }
 0x9bb   :  { %3746 = vrcp.f32 %v1824_v45 }
 0x9c1   :  { %v3741_v47 = vpop.eup %3740 }
 0x9c2   :  { %v1834_v50 = vmul.f32 %v3741_v47, %v1790_v44 }
 0x9c3   :  { %v3743_v25 = vpop.eup %3742 }
 0x9c4   :  { %v3745_v53 = vpop.eup %3744  ;;  %v1833_v55 = vmul.f32 %v3743_v25, %v1830_v49  ;;  %v1836_v56 = vadd.f32 %v4152_v46, %v1834_v50 }
 0x9c5   :  { %v1846_v54 = vmul.f32 %v3745_v53, %v1843_v51  ;;  %v3747_v59 = vpop.eup %3746  ;;  %v1839_v3 = vsub.f32 1.0, %v3745_v53 }
 0x9c6   :  { %v1835_v58 = vadd.f32 %v4150_v41, %v1833_v55  ;;  %3748 = vtanh.f32 %v1836_v56  ;;  %v1840_v61 = vsub.f32 1.0, %v3747_v59  ;;  %v1847_v7 = vmul.f32 %v3747_v59, %v1647_v2 }
 0x9c8   :  { %3750 = vtanh.f32 %v1835_v58 }
 0x9d0   :  { %v3749_v62 = vpop.eup %3748 }
 0x9d1   :  { %v1842_v5 = vmul.f32 %v3749_v62, %v1840_v61 }
 0x9d2   :  { %v3751_v8 = vpop.eup %3750 }
 0x9d3   :  { %v1841_v10 = vmul.f32 %v3751_v8, %v1839_v3  ;;  %v4190_v52 = vadd.f32 %v1847_v7, %v1842_v5 }
 0x9d5   :  { %v4192_v23 = vadd.f32 %v1846_v54, %v1841_v10  ;;  %v2051_v5 = vrot.slane %v4190_v52, 7 }
 0x9d7   :  { %v1852_v11 = vrot.slane %v4192_v23, 1  ;;  %v2050_v61 = vrot.slane %v4192_v23, 7 }
 0x9d9   :  { %v1853_v13 = vsel %vm1648_vm4, %v4190_v52, %v1852_v11 }
 0x9da   :  { %3239 = vmatmul.mubr.msk.f32.vlgmr.msra.gmra.mrb[18].mxu0 %vm90_vm0, %v1853_v13  ;;  %3440 = vmatmul.mubr.msk.f32.vlgmr.msra.gmra.mrb[24].mxu1 %vm90_vm0, %v1853_v13 }
 0x9db   :  { %3601 = vmatpush1.bf16.msra.mxu0 %v4089_v42  ;;  %3608 = vmatpush3.bf16.msra.mxu1 %v4084_v34 }
 0x9dc   :  { %3603 = vmatprep.subr.bf16.mxu0 %v4092_v43  ;;  %3609 = vmatprep.subr.bf16.mxu1 %v3952_v31 }
 0x9dd   :  { %2129 = vmatprep.mubr.f32.mxu0 %v3950_v0  ;;  %3450 = vmatprep.mubr.msk.f32.mxu1 %vm3951_vm1, %v3950_v0 }
 0x9df   :  { %3605 = vmatpush1.bf16.msra.mxu0 %v4100_v48  ;;  %3611 = vmatpush3.bf16.msra.mxu1 %v4095_v20 }
 0x9e0   :  { %3613 = vmatprep.subr.bf16.mxu0 %v4080_v30  ;;  %3620 = vmatprep.subr.bf16.mxu1 %v3952_v31 }
 0xaad   :  { %v1922_v63 = vpop.f32.mrb[18].mxu0  ;;  %v1993_v2 = vpop.f32.mrb[24].mxu1 }
 0xaae   :  { %v1923_v14 = vadd.f32 %v1922_v63, %v4124_v57  ;;  %v1924_v15 = vpop.f32.mrb[19].mxu0  ;;  %v3441_v16 = vpop.f32.mrb[25].mxu1  ;;  %v1994_v55 = vadd.f32 %v1993_v2, %v4146_v32 }
 0xaaf   :  { %v1925_v17 = vadd.f32 %v1924_v15, %v4128_v60 }
 0xab0   :  { %v1998_v18 = vrot.slane %v1923_v14, 6  ;;  %v1999_v19 = vrot.slane %v1923_v14, 7  ;;  %v2036_v56 = vrot.slane %v1994_v55, 6  ;;  %v2037_v58 = vrot.slane %v1994_v55, 7 }
 0xab1   :  { %v2017_v21 = vrot.slane %v1925_v17, 6  ;;  %v2018_v22 = vrot.slane %v1925_v17, 7 }
 0xab2   :  { %v2002_v24 = vadd.f32 %v4131_v1, %v1998_v18  ;;  %v2003_v27 = vadd.f32 %v4137_v6, %v1999_v19 }
 0xab3   :  { %v2021_v28 = vadd.f32 %v4134_v4, %v2017_v21  ;;  %v2022_v29 = vadd.f32 %v4140_v9, %v2018_v22 }
 0xab4   :  { %v2004_v33 = vsub.f32 0.0, %v2002_v24  ;;  %v2005_v35 = vsub.f32 0.0, %v2003_v27 }
 0xab5   :  { %v2023_v36 = vsub.f32 0.0, %v2021_v28  ;;  %v2024_v37 = vsub.f32 0.0, %v2022_v29 }
 0xab6   :  { %v2006_v38 = vmul.f32 1.442695, %v2004_v33  ;;  %v2008_v39 = vmul.f32 1.442695, %v2005_v35 }
 0xab7   :  { %v2025_v12 = vmul.f32 1.442695, %v2023_v36  ;;  %v2027_v40 = vmul.f32 1.442695, %v2024_v37 }
 0xab8   :  { %3752 = vpow2.f32 %v2006_v38 }
 0xab9   :  { %3754 = vpow2.f32 %v2008_v39 }
 0xaba   :  { %3756 = vpow2.f32 %v2025_v12 }
 0xabb   :  { %3758 = vpow2.f32 %v2027_v40 }
 0xac2   :  { %v3753_v44 = vpop.eup %3752 }
 0xac3   :  { %v3755_v45 = vpop.eup %3754  ;;  %v2010_v47 = vadd.f32 1.0, %v3753_v44 }
 0xac4   :  { %v3757_v49 = vpop.eup %3756  ;;  %v2011_v50 = vadd.f32 1.0, %v3755_v45 }
 0xac5   :  { %v3759_v25 = vpop.eup %3758  ;;  %3760 = vrcp.f32 %v2010_v47  ;;  %v2029_v51 = vadd.f32 1.0, %v3757_v49 }
 0xac6   :  { %3762 = vrcp.f32 %v2011_v50  ;;  %v2030_v53 = vadd.f32 1.0, %v3759_v25 }
 0xac7   :  { %3764 = vrcp.f32 %v2029_v51 }
 0xac8   :  { %3766 = vrcp.f32 %v2030_v53 }
 0xacf   :  { %v3761_v54 = vpop.eup %3760 }
 0xad0   :  { %v3763_v59 = vpop.eup %3762  ;;  %v2040_v62 = vmul.f32 %v3761_v54, %v2036_v56 }
 0xad1   :  { %v3765_v3 = vpop.eup %3764  ;;  %v2041_v7 = vmul.f32 %v3763_v59, %v2037_v58 }
 0xad2   :  { %v3767_v8 = vpop.eup %3766  ;;  %v2042_v10 = vadd.f32 %v4150_v41, %v2040_v62  ;;  %v2054_v11 = vmul.f32 %v3765_v3, %v2050_v61  ;;  %v2046_v2 = vsub.f32 1.0, %v3765_v3 }
 0xad3   :  { %v2043_v13 = vadd.f32 %v4152_v46, %v2041_v7  ;;  %v2055_v63 = vmul.f32 %v3767_v8, %v2051_v5  ;;  %v2047_v15 = vsub.f32 1.0, %v3767_v8 }
 0xad4   :  { %3768 = vtanh.f32 %v2042_v10 }
 0xad5   :  { %3770 = vtanh.f32 %v2043_v13 }
 0xade   :  { %v3769_v14 = vpop.eup %3768 }
 0xadf   :  { %v3771_v16 = vpop.eup %3770  ;;  %v2048_v17 = vmul.f32 %v3769_v14, %v2046_v2 }
 0xae0   :  { %v2049_v23 = vmul.f32 %v3771_v16, %v2047_v15 }
 0xae1   :  { %v4221_v18 = vadd.f32 %v2054_v11, %v2048_v17 }
 0xae2   :  { %v4223_v19 = vadd.f32 %v2055_v63, %v2049_v23 }
 0xae3   :  { %v2060_v52 = vrot.slane %v4221_v18, 2  ;;  %v2259_v2 = vrot.slane %v4221_v18, 7 }
 0xae4   :  { %v2061_v21 = vrot.slane %v4223_v19, 1  ;;  %v2260_v16 = vrot.slane %v4223_v19, 7 }
 0xae6   :  { %v2062_v22 = vsel %vm1648_vm4, %v2061_v21, %v2060_v52 }
 0xae7   :  { %3241 = vmatmul.mubr.msk.f32.vlgmr.msra.gmra.mrb[20].mxu0 %vm90_vm0, %v2062_v22  ;;  %3451 = vmatmul.mubr.msk.f32.vlgmr.msra.gmra.mrb[26].mxu1 %vm90_vm0, %v2062_v22 }
 0xae8   :  { %3615 = vmatpush1.bf16.msra.mxu0 %v4089_v42  ;;  %3622 = vmatpush3.bf16.msra.mxu1 %v4084_v34 }
 0xae9   :  { %3617 = vmatprep.subr.bf16.mxu0 %v4092_v43  ;;  %3623 = vmatprep.subr.bf16.mxu1 %v3952_v31 }
 0xaea   :  { %2338 = vmatprep.mubr.f32.mxu0 %v3950_v0  ;;  %3461 = vmatprep.mubr.msk.f32.mxu1 %vm3951_vm1, %v3950_v0 }
 0xaec   :  { %3619 = vmatpush1.bf16.msra.mxu0 %v4100_v48  ;;  %3625 = vmatpush3.bf16.msra.mxu1 %v4095_v20 }
 0xaed   :  { %3627 = vmatprep.subr.bf16.mxu0 %v4080_v30  ;;  %3634 = vmatprep.subr.bf16.mxu1 %v3952_v31 }
 0xbba   :  { %v2131_v24 = vpop.f32.mrb[20].mxu0  ;;  %v2202_v27 = vpop.f32.mrb[26].mxu1 }
 0xbbb   :  { %v2132_v28 = vadd.f32 %v2131_v24, %v4124_v57  ;;  %v2133_v29 = vpop.f32.mrb[21].mxu0  ;;  %v3452_v33 = vpop.f32.mrb[27].mxu1  ;;  %v2203_v8 = vadd.f32 %v2202_v27, %v4146_v32 }
 0xbbc   :  { %v2134_v35 = vadd.f32 %v2133_v29, %v4128_v60 }
 0xbbd   :  { %v2207_v36 = vrot.slane %v2132_v28, 5  ;;  %v2208_v37 = vrot.slane %v2132_v28, 6  ;;  %v2245_v10 = vrot.slane %v2203_v8, 5  ;;  %v2246_v13 = vrot.slane %v2203_v8, 6 }
 0xbbe   :  { %v2226_v38 = vrot.slane %v2134_v35, 5  ;;  %v2227_v39 = vrot.slane %v2134_v35, 6 }
 0xbbf   :  { %v2211_v12 = vadd.f32 %v4131_v1, %v2207_v36  ;;  %v2212_v40 = vadd.f32 %v4137_v6, %v2208_v37 }
 0xbc0   :  { %v2230_v44 = vadd.f32 %v4134_v4, %v2226_v38  ;;  %v2231_v45 = vadd.f32 %v4140_v9, %v2227_v39 }
 0xbc1   :  { %v2213_v47 = vsub.f32 0.0, %v2211_v12  ;;  %v2214_v49 = vsub.f32 0.0, %v2212_v40 }
 0xbc2   :  { %v2232_v50 = vsub.f32 0.0, %v2230_v44  ;;  %v2233_v25 = vsub.f32 0.0, %v2231_v45 }
 0xbc3   :  { %v2215_v51 = vmul.f32 1.442695, %v2213_v47  ;;  %v2217_v53 = vmul.f32 1.442695, %v2214_v49 }
 0xbc4   :  { %v2234_v55 = vmul.f32 1.442695, %v2232_v50  ;;  %v2236_v56 = vmul.f32 1.442695, %v2233_v25 }
 0xbc5   :  { %3772 = vpow2.f32 %v2215_v51 }
 0xbc6   :  { %3774 = vpow2.f32 %v2217_v53 }
 0xbc7   :  { %3776 = vpow2.f32 %v2234_v55 }
 0xbc8   :  { %3778 = vpow2.f32 %v2236_v56 }
 0xbcf   :  { %v3773_v54 = vpop.eup %3772 }
 0xbd0   :  { %v3775_v58 = vpop.eup %3774  ;;  %v2219_v59 = vadd.f32 1.0, %v3773_v54 }
 0xbd1   :  { %v3777_v61 = vpop.eup %3776  ;;  %v2220_v62 = vadd.f32 1.0, %v3775_v58 }
 0xbd2   :  { %v3779_v3 = vpop.eup %3778  ;;  %3780 = vrcp.f32 %v2219_v59  ;;  %v2238_v5 = vadd.f32 1.0, %v3777_v61 }
 0xbd3   :  { %3782 = vrcp.f32 %v2220_v62  ;;  %v2239_v7 = vadd.f32 1.0, %v3779_v3 }
 0xbd4   :  { %3784 = vrcp.f32 %v2238_v5 }
 0xbd5   :  { %3786 = vrcp.f32 %v2239_v7 }
 0xbdc   :  { %v3781_v11 = vpop.eup %3780 }
 0xbdd   :  { %v3783_v63 = vpop.eup %3782  ;;  %v2249_v14 = vmul.f32 %v3781_v11, %v2245_v10 }
 0xbde   :  { %v3785_v15 = vpop.eup %3784  ;;  %v2250_v17 = vmul.f32 %v3783_v63, %v2246_v13 }
 0xbdf   :  { %v3787_v23 = vpop.eup %3786  ;;  %v2251_v52 = vadd.f32 %v4150_v41, %v2249_v14  ;;  %v2263_v21 = vmul.f32 %v3785_v15, %v2259_v2  ;;  %v2255_v27 = vsub.f32 1.0, %v3785_v15 }
 0xbe0   :  { %v2252_v22 = vadd.f32 %v4152_v46, %v2250_v17  ;;  %v2264_v24 = vmul.f32 %v3787_v23, %v2260_v16  ;;  %v2256_v29 = vsub.f32 1.0, %v3787_v23 }
 0xbe1   :  { %3788 = vtanh.f32 %v2251_v52 }
 0xbe2   :  { %3790 = vtanh.f32 %v2252_v22 }
 0xbeb   :  { %v3789_v28 = vpop.eup %3788 }
 0xbec   :  { %v3791_v33 = vpop.eup %3790  ;;  %v2257_v35 = vmul.f32 %v3789_v28, %v2255_v27 }
 0xbed   :  { %v2258_v18 = vmul.f32 %v3791_v33, %v2256_v29 }
 0xbee   :  { %v4252_v36 = vadd.f32 %v2263_v21, %v2257_v35 }
 0xbef   :  { %v4254_v37 = vadd.f32 %v2264_v24, %v2258_v18 }
 0xbf0   :  { %v2269_v19 = vrot.slane %v4252_v36, 3  ;;  %v2468_v27 = vrot.slane %v4252_v36, 7 }
 0xbf1   :  { %v2270_v38 = vrot.slane %v4254_v37, 2  ;;  %v2469_v33 = vrot.slane %v4254_v37, 7 }
 0xbf3   :  { %v2271_v39 = vsel %vm1648_vm4, %v2270_v38, %v2269_v19 }
 0xbf4   :  { %3243 = vmatmul.mubr.msk.f32.vlgmr.msra.gmra.mrb[22].mxu0 %vm90_vm0, %v2271_v39  ;;  %3462 = vmatmul.mubr.msk.f32.vlgmr.msra.gmra.mrb[28].mxu1 %vm90_vm0, %v2271_v39 }
 0xbf5   :  { %3629 = vmatpush1.bf16.msra.mxu0 %v4089_v42  ;;  %3636 = vmatpush3.bf16.msra.mxu1 %v4084_v34 }
 0xbf6   :  { %3631 = vmatprep.subr.bf16.mxu0 %v4092_v43  ;;  %3637 = vmatprep.subr.bf16.mxu1 %v3952_v31 }
 0xbf7   :  { %2547 = vmatprep.mubr.f32.mxu0 %v3950_v0  ;;  %3472 = vmatprep.mubr.msk.f32.mxu1 %vm3951_vm1, %v3950_v0 }
 0xbf9   :  { %3633 = vmatpush1.bf16.msra.mxu0 %v4100_v48  ;;  %3639 = vmatpush3.bf16.msra.mxu1 %v4095_v20 }
 0xbfa   :  { %3641 = vmatprep.subr.bf16.mxu0 %v4080_v30  ;;  %3648 = vmatprep.subr.bf16.mxu1 %v3952_v31 }
 0xcc7   :  { %v2340_v12 = vpop.f32.mrb[22].mxu0  ;;  %v2411_v40 = vpop.f32.mrb[28].mxu1 }
 0xcc8   :  { %v2341_v44 = vadd.f32 %v2340_v12, %v4124_v57  ;;  %v2342_v45 = vpop.f32.mrb[23].mxu0  ;;  %v3463_v47 = vpop.f32.mrb[29].mxu1  ;;  %v2412_v23 = vadd.f32 %v2411_v40, %v4146_v32 }
 0xcc9   :  { %v2343_v49 = vadd.f32 %v2342_v45, %v4128_v60 }
 0xcca   :  { %v2416_v50 = vrot.slane %v2341_v44, 4  ;;  %v2417_v25 = vrot.slane %v2341_v44, 5  ;;  %v2454_v52 = vrot.slane %v2412_v23, 4  ;;  %v2455_v22 = vrot.slane %v2412_v23, 5 }
 0xccb   :  { %v2435_v51 = vrot.slane %v2343_v49, 4  ;;  %v2436_v53 = vrot.slane %v2343_v49, 5 }
 0xccc   :  { %v2420_v55 = vadd.f32 %v4131_v1, %v2416_v50  ;;  %v2421_v56 = vadd.f32 %v4137_v6, %v2417_v25 }
 0xccd   :  { %v2439_v54 = vadd.f32 %v4134_v4, %v2435_v51  ;;  %v2440_v58 = vadd.f32 %v4140_v9, %v2436_v53 }
 0xcce   :  { %v2422_v59 = vsub.f32 0.0, %v2420_v55  ;;  %v2423_v61 = vsub.f32 0.0, %v2421_v56 }
 0xccf   :  { %v2441_v62 = vsub.f32 0.0, %v2439_v54  ;;  %v2442_v3 = vsub.f32 0.0, %v2440_v58 }
 0xcd0   :  { %v2424_v5 = vmul.f32 1.442695, %v2422_v59  ;;  %v2426_v7 = vmul.f32 1.442695, %v2423_v61 }
 0xcd1   :  { %v2443_v8 = vmul.f32 1.442695, %v2441_v62  ;;  %v2445_v10 = vmul.f32 1.442695, %v2442_v3 }
 0xcd2   :  { %3792 = vpow2.f32 %v2424_v5 }
 0xcd3   :  { %3794 = vpow2.f32 %v2426_v7 }
 0xcd4   :  { %3796 = vpow2.f32 %v2443_v8 }
 0xcd5   :  { %3798 = vpow2.f32 %v2445_v10 }
 0xcdc   :  { %v3793_v11 = vpop.eup %3792 }
 0xcdd   :  { %v3795_v13 = vpop.eup %3794  ;;  %v2428_v63 = vadd.f32 1.0, %v3793_v11 }
 0xcde   :  { %v3797_v2 = vpop.eup %3796  ;;  %v2429_v14 = vadd.f32 1.0, %v3795_v13 }
 0xcdf   :  { %v3799_v15 = vpop.eup %3798  ;;  %3800 = vrcp.f32 %v2428_v63  ;;  %v2447_v16 = vadd.f32 1.0, %v3797_v2 }
 0xce0   :  { %3802 = vrcp.f32 %v2429_v14  ;;  %v2448_v17 = vadd.f32 1.0, %v3799_v15 }
 0xce1   :  { %3804 = vrcp.f32 %v2447_v16 }
 0xce2   :  { %3806 = vrcp.f32 %v2448_v17 }
 0xce9   :  { %v3801_v21 = vpop.eup %3800 }
 0xcea   :  { %v3803_v24 = vpop.eup %3802  ;;  %v2458_v28 = vmul.f32 %v3801_v21, %v2454_v52 }
 0xceb   :  { %v3805_v29 = vpop.eup %3804  ;;  %v2459_v35 = vmul.f32 %v3803_v24, %v2455_v22 }
 0xcec   :  { %v3807_v18 = vpop.eup %3806  ;;  %v2460_v19 = vadd.f32 %v4150_v41, %v2458_v28  ;;  %v2472_v38 = vmul.f32 %v3805_v29, %v2468_v27  ;;  %v2464_v40 = vsub.f32 1.0, %v3805_v29 }
 0xced   :  { %v2461_v39 = vadd.f32 %v4152_v46, %v2459_v35  ;;  %v2473_v12 = vmul.f32 %v3807_v18, %v2469_v33  ;;  %v2465_v45 = vsub.f32 1.0, %v3807_v18 }
 0xcee   :  { %3808 = vtanh.f32 %v2460_v19 }
 0xcef   :  { %3810 = vtanh.f32 %v2461_v39 }
 0xcf8   :  { %v3809_v44 = vpop.eup %3808 }
 0xcf9   :  { %v3811_v47 = vpop.eup %3810  ;;  %v2466_v49 = vmul.f32 %v3809_v44, %v2464_v40 }
 0xcfa   :  { %v2467_v36 = vmul.f32 %v3811_v47, %v2465_v45 }
 0xcfb   :  { %v4283_v50 = vadd.f32 %v2472_v38, %v2466_v49 }
 0xcfc   :  { %v4285_v25 = vadd.f32 %v2473_v12, %v2467_v36 }
 0xcfd   :  { %v2478_v37 = vrot.slane %v4283_v50, 4  ;;  %v2677_v12 = vrot.slane %v4283_v50, 7 }
 0xcfe   :  { %v2479_v51 = vrot.slane %v4285_v25, 3  ;;  %v2678_v45 = vrot.slane %v4285_v25, 7 }
 0xd00   :  { %v2480_v53 = vsel %vm1648_vm4, %v2479_v51, %v2478_v37 }
 0xd01   :  { %3245 = vmatmul.mubr.msk.f32.vlgmr.msra.gmra.mrb[24].mxu0 %vm90_vm0, %v2480_v53  ;;  %3473 = vmatmul.mubr.msk.f32.vlgmr.msra.gmra.mrb[30].mxu1 %vm90_vm0, %v2480_v53 }
 0xd02   :  { %3643 = vmatpush1.bf16.msra.mxu0 %v4089_v42  ;;  %3650 = vmatpush3.bf16.msra.mxu1 %v4084_v34 }
 0xd03   :  { %3645 = vmatprep.subr.bf16.mxu0 %v4092_v43  ;;  %3651 = vmatprep.subr.bf16.mxu1 %v3952_v31 }
 0xd04   :  { %2756 = vmatprep.mubr.f32.mxu0 %v3950_v0  ;;  %3483 = vmatprep.mubr.msk.f32.mxu1 %vm3951_vm1, %v3950_v0 }
 0xd06   :  { %3647 = vmatpush1.bf16.msra.mxu0 %v4100_v48  ;;  %3653 = vmatpush3.bf16.msra.mxu1 %v4095_v20 }
 0xd07   :  { %3655 = vmatprep.subr.bf16.mxu0 %v4080_v30  ;;  %3662 = vmatprep.subr.bf16.mxu1 %v3952_v31 }
 0xdd4   :  { %v2549_v55 = vpop.f32.mrb[24].mxu0  ;;  %v2620_v56 = vpop.f32.mrb[30].mxu1 }
 0xdd5   :  { %v2550_v54 = vadd.f32 %v2549_v55, %v4124_v57  ;;  %v2551_v58 = vpop.f32.mrb[25].mxu0  ;;  %v3474_v59 = vpop.f32.mrb[31].mxu1  ;;  %v2621_v35 = vadd.f32 %v2620_v56, %v4146_v32 }
 0xdd6   :  { %v2552_v61 = vadd.f32 %v2551_v58, %v4128_v60 }
 0xdd7   :  { %v2625_v62 = vrot.slane %v2550_v54, 3  ;;  %v2626_v3 = vrot.slane %v2550_v54, 4  ;;  %v2663_v18 = vrot.slane %v2621_v35, 3  ;;  %v2664_v38 = vrot.slane %v2621_v35, 4 }
 0xdd8   :  { %v2644_v5 = vrot.slane %v2552_v61, 3  ;;  %v2645_v7 = vrot.slane %v2552_v61, 4 }
 0xdd9   :  { %v2629_v8 = vadd.f32 %v4131_v1, %v2625_v62  ;;  %v2630_v10 = vadd.f32 %v4137_v6, %v2626_v3 }
 0xdda   :  { %v2648_v30 = vadd.f32 %v4134_v4, %v2644_v5  ;;  %v2649_v11 = vadd.f32 %v4140_v9, %v2645_v7 }
 0xddb   :  { %v2631_v13 = vsub.f32 0.0, %v2629_v8  ;;  %v2632_v63 = vsub.f32 0.0, %v2630_v10 }
 0xddc   :  { %v2650_v2 = vsub.f32 0.0, %v2648_v30  ;;  %v2651_v14 = vsub.f32 0.0, %v2649_v11 }
 0xddd   :  { %v2633_v15 = vmul.f32 1.442695, %v2631_v13  ;;  %v2635_v16 = vmul.f32 1.442695, %v2632_v63 }
 0xdde   :  { %v2652_v17 = vmul.f32 1.442695, %v2650_v2  ;;  %v2654_v23 = vmul.f32 1.442695, %v2651_v14 }
 0xddf   :  { %3812 = vpow2.f32 %v2633_v15 }
 0xde0   :  { %3814 = vpow2.f32 %v2635_v16 }
 0xde1   :  { %3816 = vpow2.f32 %v2652_v17 }
 0xde2   :  { %3818 = vpow2.f32 %v2654_v23 }
 0xde9   :  { %v3813_v52 = vpop.eup %3812 }
 0xdea   :  { %v3815_v21 = vpop.eup %3814  ;;  %v2637_v22 = vadd.f32 1.0, %v3813_v52 }
 0xdeb   :  { %v3817_v24 = vpop.eup %3816  ;;  %v2638_v27 = vadd.f32 1.0, %v3815_v21 }
 0xdec   :  { %v3819_v28 = vpop.eup %3818  ;;  %3820 = vrcp.f32 %v2637_v22  ;;  %v2656_v29 = vadd.f32 1.0, %v3817_v24 }
 0xded   :  { %3822 = vrcp.f32 %v2638_v27  ;;  %v2657_v33 = vadd.f32 1.0, %v3819_v28 }
 0xdee   :  { %3824 = vrcp.f32 %v2656_v29 }
 0xdef   :  { %3826 = vrcp.f32 %v2657_v33 }
 0xdf6   :  { %v3821_v19 = vpop.eup %3820 }
 0xdf7   :  { %v3823_v39 = vpop.eup %3822  ;;  %v2667_v40 = vmul.f32 %v3821_v19, %v2663_v18 }
 0xdf8   :  { %v3825_v44 = vpop.eup %3824  ;;  %v2668_v47 = vmul.f32 %v3823_v39, %v2664_v38 }
 0xdf9   :  { %v3827_v49 = vpop.eup %3826  ;;  %v2669_v36 = vadd.f32 %v4150_v41, %v2667_v40  ;;  %v2681_v37 = vmul.f32 %v3825_v44, %v2677_v12  ;;  %v2673_v55 = vsub.f32 1.0, %v3825_v44 }
 0xdfa   :  { %v2670_v51 = vadd.f32 %v4152_v46, %v2668_v47  ;;  %v2682_v53 = vmul.f32 %v3827_v49, %v2678_v45  ;;  %v2674_v54 = vsub.f32 1.0, %v3827_v49 }
 0xdfb   :  { %3828 = vtanh.f32 %v2669_v36 }
 0xdfc   :  { %3830 = vtanh.f32 %v2670_v51 }
 0xe05   :  { %v3829_v56 = vpop.eup %3828 }
 0xe06   :  { %v3831_v58 = vpop.eup %3830  ;;  %v2675_v59 = vmul.f32 %v3829_v56, %v2673_v55 }
 0xe07   :  { %v2676_v50 = vmul.f32 %v3831_v58, %v2674_v54 }
 0xe08   :  { %v4314_v61 = vadd.f32 %v2681_v37, %v2675_v59 }
 0xe09   :  { %v4316_v62 = vadd.f32 %v2682_v53, %v2676_v50 }
 0xe0a   :  { %v2687_v25 = vrot.slane %v4314_v61, 5  ;;  %v2886_v47 = vrot.slane %v4314_v61, 7 }
 0xe0b   :  { %v2688_v3 = vrot.slane %v4316_v62, 4  ;;  %v2887_v37 = vrot.slane %v4316_v62, 7 }
 0xe0d   :  { %v2689_v5 = vsel %vm1648_vm4, %v2688_v3, %v2687_v25 }
 0xe0e   :  { %3247 = vmatmul.mubr.msk.f32.vlgmr.msra.gmra.mrb[26].mxu0 %vm90_vm0, %v2689_v5  ;;  %3484 = vmatmul.mubr.msk.f32.vlgmr.msra.gmra.mrb[32].mxu1 %vm90_vm0, %v2689_v5 }
 0xe0f   :  { %3657 = vmatpush1.bf16.msra.mxu0 %v4089_v42  ;;  %3664 = vmatpush3.bf16.msra.mxu1 %v4084_v34 }
 0xe10   :  { %3659 = vmatprep.subr.bf16.mxu0 %v4092_v43  ;;  %3665 = vmatprep.subr.bf16.mxu1 %v3952_v31 }
 0xe11   :  { %2965 = vmatprep.mubr.f32.mxu0 %v3950_v0  ;;  %3494 = vmatprep.mubr.msk.f32.mxu1 %vm3951_vm1, %v3950_v0 }
 0xe13   :  { %3661 = vmatpush1.bf16.msra.mxu0 %v4100_v48  ;;  %3667 = vmatpush3.bf16.msra.mxu1 %v4095_v20 }
 0xe14   :  { %3668 = vmatprep.subr.bf16.mxu0 %v3952_v31 }
 0xee1   :  { %v2758_v7 = vpop.f32.mrb[26].mxu0  ;;  %v2829_v8 = vpop.f32.mrb[32].mxu1 }
 0xee2   :  { %v2759_v42 = vadd.f32 %v2758_v7, %v4124_v57  ;;  %v2760_v34 = vpop.f32.mrb[27].mxu0  ;;  %v3485_v10 = vpop.f32.mrb[33].mxu1  ;;  %v2830_v39 = vadd.f32 %v2829_v8, %v4146_v32 }
 0xee3   :  { %v2761_v43 = vadd.f32 %v2760_v34, %v4128_v60  ;;  %v3103_v10 = vld [vmem:[#allocation5 + $0x1e0] sm:$0xff] }
 0xee4   :  { %v2834_v30 = vrot.slane %v2759_v42, 2  ;;  %v2835_v11 = vrot.slane %v2759_v42, 3  ;;  %v2872_v12 = vrot.slane %v2830_v39, 2  ;;  %v2873_v44 = vrot.slane %v2830_v39, 3 }
 0xee5   :  { %v2853_v13 = vrot.slane %v2761_v43, 2  ;;  %v2854_v63 = vrot.slane %v2761_v43, 3  ;;  %v3104_v43 = vld [vmem:[#allocation5 + $0x1f8] sm:$0xff] }
 0xee6   :  { %v2838_v2 = vadd.f32 %v4131_v1, %v2834_v30  ;;  %v2839_v48 = vadd.f32 %v4137_v6, %v2835_v11  ;;  %v3105_v30 = vld [vmem:[#allocation5 + $0x210] sm:$0xff]  ;;  %v3669_v11 = vpack.c.bf16 %v3104_v43, %v3103_v10 }
 0xee7   :  { %v2857_v20 = vadd.f32 %v4134_v4, %v2853_v13  ;;  %v2858_v14 = vadd.f32 %v4140_v9, %v2854_v63  ;;  %v3106_v13 = vld [vmem:[#allocation5 + $0x228] sm:$0xff] }
 0xee8   :  { %v2840_v15 = vsub.f32 0.0, %v2838_v2  ;;  %v2841_v16 = vsub.f32 0.0, %v2839_v48  ;;  %v3672_v63 = vpack.c.bf16 %v3106_v13, %v3105_v30 }
 0xee9   :  { %v2859_v17 = vsub.f32 0.0, %v2857_v20  ;;  %v2860_v23 = vsub.f32 0.0, %v2858_v14 }
 0xeea   :  { %v2842_v52 = vmul.f32 1.442695, %v2840_v15  ;;  %v2844_v21 = vmul.f32 1.442695, %v2841_v16 }
 0xeeb   :  { %v2861_v22 = vmul.f32 1.442695, %v2859_v17  ;;  %v2863_v24 = vmul.f32 1.442695, %v2860_v23 }
 0xeec   :  { %3832 = vpow2.f32 %v2842_v52 }
 0xeed   :  { %3834 = vpow2.f32 %v2844_v21 }
 0xeee   :  { %3836 = vpow2.f32 %v2861_v22 }
 0xeef   :  { %3838 = vpow2.f32 %v2863_v24 }
 0xef6   :  { %v3833_v27 = vpop.eup %3832 }
 0xef7   :  { %v3835_v28 = vpop.eup %3834  ;;  %v2846_v29 = vadd.f32 1.0, %v3833_v27 }
 0xef8   :  { %v3837_v33 = vpop.eup %3836  ;;  %v2847_v35 = vadd.f32 1.0, %v3835_v28 }
 0xef9   :  { %v3839_v18 = vpop.eup %3838  ;;  %3840 = vrcp.f32 %v2846_v29  ;;  %v2865_v19 = vadd.f32 1.0, %v3837_v33 }
 0xefa   :  { %3842 = vrcp.f32 %v2847_v35  ;;  %v2866_v38 = vadd.f32 1.0, %v3839_v18 }
 0xefb   :  { %3844 = vrcp.f32 %v2865_v19 }
 0xefc   :  { %3846 = vrcp.f32 %v2866_v38 }
 0xf03   :  { %v3841_v40 = vpop.eup %3840 }
 0xf04   :  { %v3843_v45 = vpop.eup %3842  ;;  %v2876_v49 = vmul.f32 %v3841_v40, %v2872_v12 }
 0xf05   :  { %v3845_v36 = vpop.eup %3844  ;;  %v2877_v51 = vmul.f32 %v3843_v45, %v2873_v44 }
 0xf06   :  { %v3847_v53 = vpop.eup %3846  ;;  %v2878_v55 = vadd.f32 %v4150_v41, %v2876_v49  ;;  %v2890_v56 = vmul.f32 %v3845_v36, %v2886_v47  ;;  %v2882_v59 = vsub.f32 1.0, %v3845_v36 }
 0xf07   :  { %v2879_v54 = vadd.f32 %v4152_v46, %v2877_v51  ;;  %v2891_v58 = vmul.f32 %v3847_v53, %v2887_v37  ;;  %v2883_v25 = vsub.f32 1.0, %v3847_v53 }
 0xf08   :  { %3848 = vtanh.f32 %v2878_v55 }
 0xf09   :  { %3850 = vtanh.f32 %v2879_v54 }
 0xf12   :  { %v3849_v50 = vpop.eup %3848 }
 0xf13   :  { %v3851_v3 = vpop.eup %3850  ;;  %v2884_v5 = vmul.f32 %v3849_v50, %v2882_v59 }
 0xf14   :  { %v2885_v61 = vmul.f32 %v3851_v3, %v2883_v25 }
 0xf15   :  { %v4344_v7 = vadd.f32 %v2890_v56, %v2884_v5 }
 0xf16   :  { %v4346_v8 = vadd.f32 %v2891_v58, %v2885_v61 }
 0xf17   :  { %v2896_v62 = vrot.slane %v4344_v7, 6  ;;  %v3095_v36 = vrot.slane %v4344_v7, 7 }
 0xf18   :  { %v2897_v42 = vrot.slane %v4346_v8, 5  ;;  %v3096_v53 = vrot.slane %v4346_v8, 7 }
 0xf1a   :  { %v2898_v34 = vsel %vm1648_vm4, %v2897_v42, %v2896_v62 }
 0xf1b   :  { %3249 = vmatmul.mubr.msk.f32.vlgmr.msra.gmra.mrb[28].mxu0 %vm90_vm0, %v2898_v34  ;;  %3495 = vmatmul.mubr.msk.f32.vlgmr.msra.gmra.mrb[34].mxu1 %vm90_vm0, %v2898_v34 }
 0xf1c   :  { %3505 = vmatprep.mubr.msk.f32.mxu0 %vm3951_vm1, %v3950_v0  ;;  %3670 = vmatpush3.bf16.msra.mxu0 %v3669_v11 }
 0xf1d   :  { %3671 = vmatprep.subr.bf16.mxu0 %v3952_v31 }
 0xf20   :  { %3673 = vmatpush3.bf16.msra.mxu0 %v3672_v63 }
 0xfee   :  { %v2967_v2 = vpop.f32.mrb[28].mxu0  ;;  %v3038_v48 = vpop.f32.mrb[34].mxu1 }
 0xfef   :  { %v2968_v20 = vadd.f32 %v2967_v2, %v4124_v57  ;;  %v2969_v14 = vpop.f32.mrb[29].mxu0  ;;  %v3496_v15 = vpop.f32.mrb[35].mxu1  ;;  %v3039_v40 = vadd.f32 %v3038_v48, %v4146_v32 }
 0xff0   :  { %v2970_v16 = vadd.f32 %v2969_v14, %v4128_v60 }
 0xff1   :  { %v3043_v17 = vrot.slane %v2968_v20, 1  ;;  %v3044_v0 = vrot.slane %v2968_v20, 2  ;;  %v3081_v44 = vrot.slane %v3039_v40, 1  ;;  %v3082_v47 = vrot.slane %v3039_v40, 2 }
 0xff2   :  { %v3062_v23 = vrot.slane %v2970_v16, 1  ;;  %v3063_v52 = vrot.slane %v2970_v16, 2 }
 0xff3   :  { %v3047_v21 = vadd.f32 %v4131_v1, %v3043_v17  ;;  %v3048_v22 = vadd.f32 %v4137_v6, %v3044_v0 }
 0xff4   :  { %v3066_v24 = vadd.f32 %v4134_v4, %v3062_v23  ;;  %v3067_v31 = vadd.f32 %v4140_v9, %v3063_v52 }
 0xff5   :  { %v3049_v27 = vsub.f32 0.0, %v3047_v21  ;;  %v3050_v28 = vsub.f32 0.0, %v3048_v22 }
 0xff6   :  { %v3068_v29 = vsub.f32 0.0, %v3066_v24  ;;  %v3069_v57 = vsub.f32 0.0, %v3067_v31 }
 0xff7   :  { %v3051_v33 = vmul.f32 1.442695, %v3049_v27  ;;  %v3053_v35 = vmul.f32 1.442695, %v3050_v28 }
 0xff8   :  { %v3070_v18 = vmul.f32 1.442695, %v3068_v29  ;;  %v3072_v60 = vmul.f32 1.442695, %v3069_v57 }
 0xff9   :  { %3852 = vpow2.f32 %v3051_v33 }
 0xffa   :  { %3854 = vpow2.f32 %v3053_v35 }
 0xffb   :  { %3856 = vpow2.f32 %v3070_v18 }
 0xffc   :  { %3858 = vpow2.f32 %v3072_v60 }
0x1003   :  { %v3853_v19 = vpop.eup %3852 }
0x1004   :  { %v3855_v1 = vpop.eup %3854  ;;  %v3055_v38 = vadd.f32 1.0, %v3853_v19 }
0x1005   :  { %v3857_v6 = vpop.eup %3856  ;;  %v3056_v39 = vadd.f32 1.0, %v3855_v1 }
0x1006   :  { %v3859_v4 = vpop.eup %3858  ;;  %3860 = vrcp.f32 %v3055_v38  ;;  %v3074_v9 = vadd.f32 1.0, %v3857_v6 }
0x1007   :  { %3862 = vrcp.f32 %v3056_v39  ;;  %v3075_v12 = vadd.f32 1.0, %v3859_v4 }
0x1008   :  { %3864 = vrcp.f32 %v3074_v9 }
0x1009   :  { %3866 = vrcp.f32 %v3075_v12 }
0x1010   :  { %v3861_v45 = vpop.eup %3860 }
0x1011   :  { %v3863_v49 = vpop.eup %3862  ;;  %v3085_v37 = vmul.f32 %v3861_v45, %v3081_v44 }
0x1012   :  { %v3865_v51 = vpop.eup %3864  ;;  %v3086_v55 = vmul.f32 %v3863_v49, %v3082_v47 }
0x1013   :  { %v3867_v56 = vpop.eup %3866  ;;  %v3087_v54 = vadd.f32 %v4150_v41, %v3085_v37  ;;  %v3099_v58 = vmul.f32 %v3865_v51, %v3095_v36  ;;  %v3091_v32 = vsub.f32 1.0, %v3865_v51  ;;  %v3108_v41 = vld [vmem:[#allocation5 + $0x240] ss:$8 sm:$0x7] }
0x1014   :  { %v3088_v59 = vadd.f32 %v4152_v46, %v3086_v55  ;;  %v3100_v50 = vmul.f32 %v3867_v56, %v3096_v53  ;;  %v3092_v3 = vsub.f32 1.0, %v3867_v56  ;;  %v3113_v46 = vrot.slane %v3108_v41, %v4017_v26 }
0x1015   :  { %3868 = vtanh.f32 %v3087_v54 }
0x1016   :  { %3870 = vtanh.f32 %v3088_v59 }
0x101f   :  { %v3869_v25 = vpop.eup %3868 }
0x1020   :  { %v3871_v5 = vpop.eup %3870  ;;  %v3093_v61 = vmul.f32 %v3869_v25, %v3091_v32 }
0x1021   :  { %v3094_v7 = vmul.f32 %v3871_v5, %v3092_v3 }
0x1022   :  { %v3101_v62 = vadd.f32 %v3099_v58, %v3093_v61 }
0x1023   :  { %v3102_v42 = vadd.f32 %v3100_v50, %v3094_v7 }
0x1024   :  { %v3117_v34 = vrot.slane %v3101_v62, 7 }
0x1025   :  { %v3118_v8 = vrot.slane %v3102_v42, 6 }
0x1027   :  { %v3119_v10 = vsel %vm1648_vm4, %v3118_v8, %v3117_v34 }
0x1028   :  { %3506 = vmatmul.mubr.msk.f32.vlgmr.msra.gmra.mrb[30].mxu0 %vm90_vm0, %v3119_v10 }
0x10fb   :  { %v3188_v43 = vpop.f32.mrb[30].mxu0 }
0x10fc   :  { %v3189_v30 = vadd.f32 %v3188_v43, %v3113_v46  ;;  %v3507_v11 = vpop.f32.mrb[31].mxu0 }
0x10fe   :  { %3192 = vst [vmem:[#allocation7] sm:$0x3] %v3189_v30 }
0x10ff   :  { %3927 = shalt.err (!%p3924_p6)
}
0x1100   :  { %s3928_s12 = scalar_lea.hbm %s4384_s2, 32 }
0x1101   :  { %p3929_p7 = scmp.ne.s32.totalorder %s4384_s2, %s3928_s12  ;;  %p3932_p8 = scmp.lt.u32.totalorder %s3928_s12, %s4384_s2 }
0x1103   :  { %p3934_p9 = pnand %p3932_p8, %p3929_p7 }
0x1105   :  { %3937 = shalt.err (!%p3934_p9)
}
0x1106   :  { %3202 = dma.vmem_to_hbm [thread:$0]  %s3200_s8, 32, %s4384_s2, [#allocation4]  }
0x1107   :  { %3942 = dma.done.wait [#allocation4], 32  }
0x1108   :  { %3943 = vsyncadd [#allocation4], 4294967264 }
0x1109   :  { %3206 = vsyncpa [#allocation3], 1 }
0x110a   :  { %3207 = vsyncpa [#allocation6], 1 }
0x110b   :  { %3208 = vsyncpa [#allocation4], 1 }

</bundles_post_ra>
